<compile_context>
chip_gen: v7x
topology: tpu7x:2x2x1
jax: 0.10.0
libtpu: 0.0.40
codegen_flags: <defaults>
</compile_context>

<pallas_src>
import jax
import jax.numpy as jnp
from jax.experimental import pallas as pl
from jax.experimental.pallas import tpu as pltpu

# Constants mirroring torchdrug's data.Protein tables used by the module.
NUM_RESIDUE_TYPE = 20   # len(data.Protein.residue2id)
NUM_ATOM_NAMES = 37     # len(data.Protein.atom_name2id)
CA_ID = 1               # data.Protein.atom_name2id['CA']
K_PAD = 128             # A*3 = 111 zero-padded to one full lane tile


# ----------------------------------------------------------------------------
# Pallas kernel (feature-major): in-register residue-type placement,
# folded embedding, 4-layer MLP with ReLUs.  All tensors are [feat, nodes].
# ----------------------------------------------------------------------------
def _encoder_mlp_kernel(crd_ref, oh_ref,
                        w1ct_ref, w1at_ref, b1_ref,
                        w2t_ref, b2_ref,
                        w3t_ref, b3_ref,
                        w4t_ref, b4_ref,
                        out_ref):
    crd = crd_ref[...]                      # (K_PAD, tn)  bf16, compact coords
    oh = oh_ref[...]                        # (R, tn)      f32, residue one-hot

    # aa-embedding contribution, embedding folded through W1a on the host:
    #   (2H, R) @ (R, tn) -> (2H, tn)
    h = jnp.dot(w1at_ref[...], oh, preferred_element_type=jnp.float32)

    # Residue-type "placement" done in-register: for each residue type r,
    # matmul the compact coords against that type's W1 slice and gate the
    # result with the one-hot row (exactly == crd_feat @ W1c of the reference).
    for r in range(NUM_RESIDUE_TYPE):
        p = jnp.dot(w1ct_ref[r], crd,                      # (2H, K_PAD)@(K_PAD, tn)
                    preferred_element_type=jnp.float32)    # -> (2H, tn) f32
        h = h + oh[r:r + 1, :] * p

    # MLP: Linear -> ReLU x3 -> Linear (all weights pre-transposed, bf16).
    h = jnp.maximum(h + b1_ref[...], 0.0).astype(jnp.bfloat16)          # (2H, tn)
    h = jnp.maximum(
        jnp.dot(w2t_ref[...], h, preferred_element_type=jnp.float32)
        + b2_ref[...], 0.0).astype(jnp.bfloat16)                        # (H, tn)
    h = jnp.maximum(
        jnp.dot(w3t_ref[...], h, preferred_element_type=jnp.float32)
        + b3_ref[...], 0.0).astype(jnp.bfloat16)                        # (H, tn)
    out_ref[...] = (jnp.dot(w4t_ref[...], h,
                            preferred_element_type=jnp.float32)
                    + b4_ref[...])                                      # (H, tn) f32


# ----------------------------------------------------------------------------
# Wrapper: geometry preprocessing + weight prep + pallas_call.
# ----------------------------------------------------------------------------
def per_residue_encoder(params, atom_pos, atom_pos_mask, frame, residue_type,
                        *, tile_n=256):
    N, A, _ = atom_pos.shape
    R = NUM_RESIDUE_TYPE
    H = params["embed"].shape[1]
    D_crd = R * A * 3
    assert A * 3 <= K_PAD

    # residue_type[residue_type == -1] = R - 1
    rt = jnp.where(residue_type == -1, R - 1, residue_type).astype(jnp.int32)

    # crd14 = atom_pos - atom_pos[:, None, CA]; rotate by frame; mask atoms.
    crd = atom_pos - atom_pos[:, CA_ID, :][:, None, :]
    crd = jnp.einsum("bij,bkj->bki", frame, crd)
    crd = jnp.where(atom_pos_mask[..., None] != 0, crd, 0.0)
    crd = crd.reshape(N, A * 3).astype(jnp.float32)          # compact (N, 111)

    onehot = jax.nn.one_hot(rt, R, dtype=jnp.float32)        # (N, R)

    # Node tiling: lane axis, multiple of 128, clamped for small N.
    tile_n = max(128, (min(tile_n, pl.cdiv(N, 128) * 128) // 128) * 128)
    n_pad = pl.cdiv(N, tile_n) * tile_n
    grid = (n_pad // tile_n,)

    # Feature-major, padded, streamed inputs.
    crd_t = jnp.pad(crd.T, ((0, K_PAD - A * 3), (0, n_pad - N))
                    ).astype(jnp.bfloat16)                   # (K_PAD, n_pad)
    oh_t = jnp.pad(onehot.T, ((0, 0), (0, n_pad - N)))       # (R, n_pad) f32

    # Weight prep (done once, host side).
    # W1 coordinate part, reshaped per residue type, K padded to 128, transposed.
    w1c = params["w1"][:D_crd].reshape(R, A * 3, 2 * H)
    w1c = jnp.pad(w1c, ((0, 0), (0, K_PAD - A * 3), (0, 0)))     # (R, 128, 2H)
    w1ct = jnp.transpose(w1c, (0, 2, 1)).astype(jnp.bfloat16)    # (R, 2H, 128)
    # Embedding folded through W1's aa part: (R,H)@(H,2H) -> (R,2H), transposed.
    w1at = (params["embed"] @ params["w1"][D_crd:]).T.astype(jnp.float32)  # (2H, R)
    b1t = params["b1"].reshape(2 * H, 1).astype(jnp.float32)
    w2t = params["w2"].T.astype(jnp.bfloat16)                    # (H, 2H)
    b2t = params["b2"].reshape(H, 1).astype(jnp.float32)
    w3t = params["w3"].T.astype(jnp.bfloat16)                    # (H, H)
    b3t = params["b3"].reshape(H, 1).astype(jnp.float32)
    w4t = params["w4"].T.astype(jnp.bfloat16)                    # (H, H)
    b4t = params["b4"].reshape(H, 1).astype(jnp.float32)

    def const_spec(shape):
        nd = len(shape)
        return pl.BlockSpec(shape, lambda i, _nd=nd: (0,) * _nd)

    # Advisory cost estimate so XLA schedules the surrounding glue well.
    flops = 2 * n_pad * (2 * H * R                 # folded embedding matmul
                         + R * 2 * H * K_PAD       # placement matmuls
                         + 2 * H * H + H * H + H * H)
    weight_bytes = int(w1ct.size * 2 + w1at.size * 4
                       + w2t.size * 2 + w3t.size * 2 + w4t.size * 2
                       + (b1t.size + b2t.size + b3t.size + b4t.size) * 4)
    bytes_accessed = int(crd_t.size * 2 + oh_t.size * 4
                         + n_pad * H * 4 + weight_bytes)

    out_t = pl.pallas_call(
        _encoder_mlp_kernel,
        out_shape=jax.ShapeDtypeStruct((H, n_pad), jnp.float32),
        grid_spec=pltpu.PrefetchScalarGridSpec(
            num_scalar_prefetch=0,
            grid=grid,
            in_specs=[
                pl.BlockSpec((K_PAD, tile_n), lambda i: (0, i)),   # coords (bf16)
                pl.BlockSpec((R, tile_n), lambda i: (0, i)),       # one-hot (f32)
                const_spec((R, 2 * H, K_PAD)),                     # W1 crd slices
                const_spec((2 * H, R)),                            # embed @ W1a, T
                const_spec((2 * H, 1)),                            # b1
                const_spec((H, 2 * H)),                            # W2^T
                const_spec((H, 1)),                                # b2
                const_spec((H, H)),                                # W3^T
                const_spec((H, 1)),                                # b3
                const_spec((H, H)),                                # W4^T
                const_spec((H, 1)),                                # b4
            ],
            out_specs=pl.BlockSpec((H, tile_n), lambda i: (0, i)),
        ),
        compiler_params=pltpu.CompilerParams(
            dimension_semantics=("parallel",)),
        cost_estimate=pl.CostEstimate(flops=int(flops), transcendentals=0,
                                      bytes_accessed=bytes_accessed),
    )(crd_t, oh_t, w1ct, w1at, b1t, w2t, b2t, w3t, b3t, w4t, b4t)

    # Back to node-major (N, H); drop node padding.
    return out_t[:, :N].T


# ----------------------------------------------------------------------------
# Pure-JAX reference reproducing the PyTorch forward (for verification).
# ----------------------------------------------------------------------------
def reference_forward(params, atom_pos, atom_pos_mask, frame, residue_type):
    R, A = NUM_RESIDUE_TYPE, NUM_ATOM_NAMES
    rt = jnp.where(residue_type == -1, R - 1, residue_type)
    crd = atom_pos - atom_pos[:, CA_ID, :][:, None, :]
    crd = jnp.einsum("bij,bkj->bki", frame, crd)
    crd = jnp.where(atom_pos_mask[..., None] != 0, crd, jnp.zeros_like(crd))
    place = rt[:, None, None, None] == jnp.arange(R)[None, :, None, None]
    crd_exp = jnp.where(place, crd[:, None, :, :],
                        jnp.zeros_like(crd)[:, None, :, :])
    crd_feat = crd_exp.reshape(atom_pos.shape[0], R * A * 3)
    aa_feat = params["embed"][rt]
    x = jnp.concatenate([crd_feat, aa_feat], axis=-1)
    h = jax.nn.relu(x @ params["w1"] + params["b1"])
    h = jax.nn.relu(h @ params["w2"] + params["b2"])
    h = jax.nn.relu(h @ params["w3"] + params["b3"])
    return h @ params["w4"] + params["b4"]


def init_params(key, hidden_dim):
    R, A, H = NUM_RESIDUE_TYPE, NUM_ATOM_NAMES, hidden_dim
    d_in = R * A * 3 + H
    ks = jax.random.split(key, 9)
    # Weights stored as (in, out), i.e. PyTorch nn.Linear(in, out).weight.T
    return {
        "embed": 0.10 * jax.random.normal(ks[0], (R, H), jnp.float32),
        "w1": 0.02 * jax.random.normal(ks[1], (d_in, 2 * H), jnp.float32),
        "b1": 0.02 * jax.random.normal(ks[2], (2 * H,), jnp.float32),
        "w2": 0.05 * jax.random.normal(ks[3], (2 * H, H), jnp.float32),
        "b2": 0.05 * jax.random.normal(ks[4], (H,), jnp.float32),
        "w3": 0.05 * jax.random.normal(ks[5], (H, H), jnp.float32),
        "b3": 0.05 * jax.random.normal(ks[6], (H,), jnp.float32),
        "w4": 0.05 * jax.random.normal(ks[7], (H, H), jnp.float32),
        "b4": 0.05 * jax.random.normal(ks[8], (H,), jnp.float32),
    }


if __name__ == "__main__":
    HIDDEN = 32
    N_NODE = 40   # small, non-multiple-of-tile, exercises node padding

    root = jax.random.PRNGKey(0)
    kp, ka, km, kf, kr = jax.random.split(root, 5)

    params = init_params(kp, HIDDEN)

    atom_pos = jax.random.normal(ka, (N_NODE, NUM_ATOM_NAMES, 3), jnp.float32)
    atom_pos_mask = (jax.random.uniform(km, (N_NODE, NUM_ATOM_NAMES)) > 0.3
                     ).astype(jnp.float32)
    frame = jax.random.normal(kf, (N_NODE, 3, 3), jnp.float32)
    residue_type = jax.random.randint(kr, (N_NODE,), -1, NUM_RESIDUE_TYPE,
                                      dtype=jnp.int32)  # includes the -1 case

    out = per_residue_encoder(params, atom_pos, atom_pos_mask, frame,
                              residue_type)
    out = jax.block_until_ready(out)

    ref = reference_forward(params, atom_pos, atom_pos_mask, frame,
                            residue_type)
    assert out.shape == (N_NODE, HIDDEN)
    # bf16 weights / coordinate stream with f32 accumulation -> relaxed tolerance
    max_err = float(jnp.max(jnp.abs(out - ref)))
    assert jnp.allclose(out, ref, rtol=3e-2, atol=3e-2), \
        f"mismatch vs reference (max abs err {max_err})"

    print("KERNEL_OK")
</pallas_src>

<mosaic_0001>
module attributes {stable_mosaic.version = 11 : i64} {
  func.func @_encoder_mlp_kernel(%arg0: i32, %arg1: memref<128x128xbf16, #tpu.memory_space<vmem>>, %arg2: memref<20x128xf32, #tpu.memory_space<vmem>>, %arg3: memref<20x64x128xbf16, #tpu.memory_space<vmem>>, %arg4: memref<64x20xf32, #tpu.memory_space<vmem>>, %arg5: memref<64x1xf32, #tpu.memory_space<vmem>>, %arg6: memref<32x64xbf16, #tpu.memory_space<vmem>>, %arg7: memref<32x1xf32, #tpu.memory_space<vmem>>, %arg8: memref<32x32xbf16, #tpu.memory_space<vmem>>, %arg9: memref<32x1xf32, #tpu.memory_space<vmem>>, %arg10: memref<32x32xbf16, #tpu.memory_space<vmem>>, %arg11: memref<32x1xf32, #tpu.memory_space<vmem>>, %arg12: memref<32x128xf32, #tpu.memory_space<vmem>>) attributes {dimension_semantics = [#tpu.dimension_semantics<parallel>], iteration_bounds = array<i64: 1>, scalar_prefetch = 0 : i64, scratch_operands = 0 : i64, tpu.core_type = #tpu.core_type<tc>, window_params = [{transform_indices = @transform_0, window_bounds = array<i64: 128, 128>}, {transform_indices = @transform_1, window_bounds = array<i64: 20, 128>}, {pipeline_mode = #tpu.pipeline_mode<synchronous>, transform_indices = @transform_2, window_bounds = array<i64: 20, 64, 128>}, {pipeline_mode = #tpu.pipeline_mode<synchronous>, transform_indices = @transform_3, window_bounds = array<i64: 64, 20>}, {pipeline_mode = #tpu.pipeline_mode<synchronous>, transform_indices = @transform_4, window_bounds = array<i64: 64, 1>}, {pipeline_mode = #tpu.pipeline_mode<synchronous>, transform_indices = @transform_5, window_bounds = array<i64: 32, 64>}, {pipeline_mode = #tpu.pipeline_mode<synchronous>, transform_indices = @transform_6, window_bounds = array<i64: 32, 1>}, {pipeline_mode = #tpu.pipeline_mode<synchronous>, transform_indices = @transform_7, window_bounds = array<i64: 32, 32>}, {pipeline_mode = #tpu.pipeline_mode<synchronous>, transform_indices = @transform_8, window_bounds = array<i64: 32, 1>}, {pipeline_mode = #tpu.pipeline_mode<synchronous>, transform_indices = @transform_9, window_bounds = array<i64: 32, 32>}, {pipeline_mode = #tpu.pipeline_mode<synchronous>, transform_indices = @transform_10, window_bounds = array<i64: 32, 1>}, {transform_indices = @transform_11, window_bounds = array<i64: 32, 128>}]} {
    %c0 = arith.constant 0 : index
    %c0_0 = arith.constant 0 : index
    %0 = vector.load %arg1[%c0, %c0_0] : memref<128x128xbf16, #tpu.memory_space<vmem>>, vector<128x128xbf16>
    %c0_1 = arith.constant 0 : index
    %c0_2 = arith.constant 0 : index
    %1 = vector.load %arg2[%c0_1, %c0_2] : memref<20x128xf32, #tpu.memory_space<vmem>>, vector<20x128xf32>
    %c0_3 = arith.constant 0 : index
    %c0_4 = arith.constant 0 : index
    %2 = vector.load %arg4[%c0_3, %c0_4] : memref<64x20xf32, #tpu.memory_space<vmem>>, vector<64x20xf32>
    %cst = arith.constant dense<0.000000e+00> : vector<64x128xf32>
    %3 = tpu.matmul %2, %1, %cst {dimension_numbers = #tpu.dot_dimension_numbers<[1], [0], [0], [1], [0, 0, 1, 1], [], []>} : vector<64x20xf32>, vector<20x128xf32>, vector<64x128xf32> -> vector<64x128xf32>
    %c0_5 = arith.constant 0 : index
    %c0_6 = arith.constant 0 : index
    %c0_7 = arith.constant 0 : index
    %4 = vector.load %arg3[%c0_5, %c0_6, %c0_7] : memref<20x64x128xbf16, #tpu.memory_space<vmem>>, vector<1x64x128xbf16>
    %5 = vector.shape_cast %4 : vector<1x64x128xbf16> to vector<64x128xbf16>
    %cst_8 = arith.constant dense<0.000000e+00> : vector<64x128xf32>
    %6 = tpu.matmul %5, %0, %cst_8 {dimension_numbers = #tpu.dot_dimension_numbers<[1], [0], [0], [1], [0, 0, 1, 1], [], []>} : vector<64x128xbf16>, vector<128x128xbf16>, vector<64x128xf32> -> vector<64x128xf32>
    %7 = vector.extract_strided_slice %1 {offsets = [0, 0], sizes = [1, 128], strides = [1, 1]} : vector<20x128xf32> to vector<1x128xf32>
    %8 = vector.broadcast %7 : vector<1x128xf32> to vector<64x128xf32>
    %9 = arith.mulf %8, %6 : vector<64x128xf32>
    %10 = arith.addf %3, %9 : vector<64x128xf32>
    %c1 = arith.constant 1 : index
    %c0_9 = arith.constant 0 : index
    %c0_10 = arith.constant 0 : index
    %11 = vector.load %arg3[%c1, %c0_9, %c0_10] : memref<20x64x128xbf16, #tpu.memory_space<vmem>>, vector<1x64x128xbf16>
    %12 = vector.shape_cast %11 : vector<1x64x128xbf16> to vector<64x128xbf16>
    %cst_11 = arith.constant dense<0.000000e+00> : vector<64x128xf32>
    %13 = tpu.matmul %12, %0, %cst_11 {dimension_numbers = #tpu.dot_dimension_numbers<[1], [0], [0], [1], [0, 0, 1, 1], [], []>} : vector<64x128xbf16>, vector<128x128xbf16>, vector<64x128xf32> -> vector<64x128xf32>
    %14 = vector.extract_strided_slice %1 {offsets = [1, 0], sizes = [1, 128], strides = [1, 1]} : vector<20x128xf32> to vector<1x128xf32>
    %15 = vector.broadcast %14 : vector<1x128xf32> to vector<64x128xf32>
    %16 = arith.mulf %15, %13 : vector<64x128xf32>
    %17 = arith.addf %10, %16 : vector<64x128xf32>
    %c2 = arith.constant 2 : index
    %c0_12 = arith.constant 0 : index
    %c0_13 = arith.constant 0 : index
    %18 = vector.load %arg3[%c2, %c0_12, %c0_13] : memref<20x64x128xbf16, #tpu.memory_space<vmem>>, vector<1x64x128xbf16>
    %19 = vector.shape_cast %18 : vector<1x64x128xbf16> to vector<64x128xbf16>
    %cst_14 = arith.constant dense<0.000000e+00> : vector<64x128xf32>
    %20 = tpu.matmul %19, %0, %cst_14 {dimension_numbers = #tpu.dot_dimension_numbers<[1], [0], [0], [1], [0, 0, 1, 1], [], []>} : vector<64x128xbf16>, vector<128x128xbf16>, vector<64x128xf32> -> vector<64x128xf32>
    %21 = vector.extract_strided_slice %1 {offsets = [2, 0], sizes = [1, 128], strides = [1, 1]} : vector<20x128xf32> to vector<1x128xf32>
    %22 = vector.broadcast %21 : vector<1x128xf32> to vector<64x128xf32>
    %23 = arith.mulf %22, %20 : vector<64x128xf32>
    %24 = arith.addf %17, %23 : vector<64x128xf32>
    %c3 = arith.constant 3 : index
    %c0_15 = arith.constant 0 : index
    %c0_16 = arith.constant 0 : index
    %25 = vector.load %arg3[%c3, %c0_15, %c0_16] : memref<20x64x128xbf16, #tpu.memory_space<vmem>>, vector<1x64x128xbf16>
    %26 = vector.shape_cast %25 : vector<1x64x128xbf16> to vector<64x128xbf16>
    %cst_17 = arith.constant dense<0.000000e+00> : vector<64x128xf32>
    %27 = tpu.matmul %26, %0, %cst_17 {dimension_numbers = #tpu.dot_dimension_numbers<[1], [0], [0], [1], [0, 0, 1, 1], [], []>} : vector<64x128xbf16>, vector<128x128xbf16>, vector<64x128xf32> -> vector<64x128xf32>
    %28 = vector.extract_strided_slice %1 {offsets = [3, 0], sizes = [1, 128], strides = [1, 1]} : vector<20x128xf32> to vector<1x128xf32>
    %29 = vector.broadcast %28 : vector<1x128xf32> to vector<64x128xf32>
    %30 = arith.mulf %29, %27 : vector<64x128xf32>
    %31 = arith.addf %24, %30 : vector<64x128xf32>
    %c4 = arith.constant 4 : index
    %c0_18 = arith.constant 0 : index
    %c0_19 = arith.constant 0 : index
    %32 = vector.load %arg3[%c4, %c0_18, %c0_19] : memref<20x64x128xbf16, #tpu.memory_space<vmem>>, vector<1x64x128xbf16>
    %33 = vector.shape_cast %32 : vector<1x64x128xbf16> to vector<64x128xbf16>
    %cst_20 = arith.constant dense<0.000000e+00> : vector<64x128xf32>
    %34 = tpu.matmul %33, %0, %cst_20 {dimension_numbers = #tpu.dot_dimension_numbers<[1], [0], [0], [1], [0, 0, 1, 1], [], []>} : vector<64x128xbf16>, vector<128x128xbf16>, vector<64x128xf32> -> vector<64x128xf32>
    %35 = vector.extract_strided_slice %1 {offsets = [4, 0], sizes = [1, 128], strides = [1, 1]} : vector<20x128xf32> to vector<1x128xf32>
    %36 = vector.broadcast %35 : vector<1x128xf32> to vector<64x128xf32>
    %37 = arith.mulf %36, %34 : vector<64x128xf32>
    %38 = arith.addf %31, %37 : vector<64x128xf32>
    %c5 = arith.constant 5 : index
    %c0_21 = arith.constant 0 : index
    %c0_22 = arith.constant 0 : index
    %39 = vector.load %arg3[%c5, %c0_21, %c0_22] : memref<20x64x128xbf16, #tpu.memory_space<vmem>>, vector<1x64x128xbf16>
    %40 = vector.shape_cast %39 : vector<1x64x128xbf16> to vector<64x128xbf16>
    %cst_23 = arith.constant dense<0.000000e+00> : vector<64x128xf32>
    %41 = tpu.matmul %40, %0, %cst_23 {dimension_numbers = #tpu.dot_dimension_numbers<[1], [0], [0], [1], [0, 0, 1, 1], [], []>} : vector<64x128xbf16>, vector<128x128xbf16>, vector<64x128xf32> -> vector<64x128xf32>
    %42 = vector.extract_strided_slice %1 {offsets = [5, 0], sizes = [1, 128], strides = [1, 1]} : vector<20x128xf32> to vector<1x128xf32>
    %43 = vector.broadcast %42 : vector<1x128xf32> to vector<64x128xf32>
    %44 = arith.mulf %43, %41 : vector<64x128xf32>
    %45 = arith.addf %38, %44 : vector<64x128xf32>
    %c6 = arith.constant 6 : index
    %c0_24 = arith.constant 0 : index
    %c0_25 = arith.constant 0 : index
    %46 = vector.load %arg3[%c6, %c0_24, %c0_25] : memref<20x64x128xbf16, #tpu.memory_space<vmem>>, vector<1x64x128xbf16>
    %47 = vector.shape_cast %46 : vector<1x64x128xbf16> to vector<64x128xbf16>
    %cst_26 = arith.constant dense<0.000000e+00> : vector<64x128xf32>
    %48 = tpu.matmul %47, %0, %cst_26 {dimension_numbers = #tpu.dot_dimension_numbers<[1], [0], [0], [1], [0, 0, 1, 1], [], []>} : vector<64x128xbf16>, vector<128x128xbf16>, vector<64x128xf32> -> vector<64x128xf32>
    %49 = vector.extract_strided_slice %1 {offsets = [6, 0], sizes = [1, 128], strides = [1, 1]} : vector<20x128xf32> to vector<1x128xf32>
    %50 = vector.broadcast %49 : vector<1x128xf32> to vector<64x128xf32>
    %51 = arith.mulf %50, %48 : vector<64x128xf32>
    %52 = arith.addf %45, %51 : vector<64x128xf32>
    %c7 = arith.constant 7 : index
    %c0_27 = arith.constant 0 : index
    %c0_28 = arith.constant 0 : index
    %53 = vector.load %arg3[%c7, %c0_27, %c0_28] : memref<20x64x128xbf16, #tpu.memory_space<vmem>>, vector<1x64x128xbf16>
    %54 = vector.shape_cast %53 : vector<1x64x128xbf16> to vector<64x128xbf16>
    %cst_29 = arith.constant dense<0.000000e+00> : vector<64x128xf32>
    %55 = tpu.matmul %54, %0, %cst_29 {dimension_numbers = #tpu.dot_dimension_numbers<[1], [0], [0], [1], [0, 0, 1, 1], [], []>} : vector<64x128xbf16>, vector<128x128xbf16>, vector<64x128xf32> -> vector<64x128xf32>
    %56 = vector.extract_strided_slice %1 {offsets = [7, 0], sizes = [1, 128], strides = [1, 1]} : vector<20x128xf32> to vector<1x128xf32>
    %57 = vector.broadcast %56 : vector<1x128xf32> to vector<64x128xf32>
    %58 = arith.mulf %57, %55 : vector<64x128xf32>
    %59 = arith.addf %52, %58 : vector<64x128xf32>
    %c8 = arith.constant 8 : index
    %c0_30 = arith.constant 0 : index
    %c0_31 = arith.constant 0 : index
    %60 = vector.load %arg3[%c8, %c0_30, %c0_31] : memref<20x64x128xbf16, #tpu.memory_space<vmem>>, vector<1x64x128xbf16>
    %61 = vector.shape_cast %60 : vector<1x64x128xbf16> to vector<64x128xbf16>
    %cst_32 = arith.constant dense<0.000000e+00> : vector<64x128xf32>
    %62 = tpu.matmul %61, %0, %cst_32 {dimension_numbers = #tpu.dot_dimension_numbers<[1], [0], [0], [1], [0, 0, 1, 1], [], []>} : vector<64x128xbf16>, vector<128x128xbf16>, vector<64x128xf32> -> vector<64x128xf32>
    %63 = vector.extract_strided_slice %1 {offsets = [8, 0], sizes = [1, 128], strides = [1, 1]} : vector<20x128xf32> to vector<1x128xf32>
    %64 = vector.broadcast %63 : vector<1x128xf32> to vector<64x128xf32>
    %65 = arith.mulf %64, %62 : vector<64x128xf32>
    %66 = arith.addf %59, %65 : vector<64x128xf32>
    %c9 = arith.constant 9 : index
    %c0_33 = arith.constant 0 : index
    %c0_34 = arith.constant 0 : index
    %67 = vector.load %arg3[%c9, %c0_33, %c0_34] : memref<20x64x128xbf16, #tpu.memory_space<vmem>>, vector<1x64x128xbf16>
    %68 = vector.shape_cast %67 : vector<1x64x128xbf16> to vector<64x128xbf16>
    %cst_35 = arith.constant dense<0.000000e+00> : vector<64x128xf32>
    %69 = tpu.matmul %68, %0, %cst_35 {dimension_numbers = #tpu.dot_dimension_numbers<[1], [0], [0], [1], [0, 0, 1, 1], [], []>} : vector<64x128xbf16>, vector<128x128xbf16>, vector<64x128xf32> -> vector<64x128xf32>
    %70 = vector.extract_strided_slice %1 {offsets = [9, 0], sizes = [1, 128], strides = [1, 1]} : vector<20x128xf32> to vector<1x128xf32>
    %71 = vector.broadcast %70 : vector<1x128xf32> to vector<64x128xf32>
    %72 = arith.mulf %71, %69 : vector<64x128xf32>
    %73 = arith.addf %66, %72 : vector<64x128xf32>
    %c10 = arith.constant 10 : index
    %c0_36 = arith.constant 0 : index
    %c0_37 = arith.constant 0 : index
    %74 = vector.load %arg3[%c10, %c0_36, %c0_37] : memref<20x64x128xbf16, #tpu.memory_space<vmem>>, vector<1x64x128xbf16>
    %75 = vector.shape_cast %74 : vector<1x64x128xbf16> to vector<64x128xbf16>
    %cst_38 = arith.constant dense<0.000000e+00> : vector<64x128xf32>
    %76 = tpu.matmul %75, %0, %cst_38 {dimension_numbers = #tpu.dot_dimension_numbers<[1], [0], [0], [1], [0, 0, 1, 1], [], []>} : vector<64x128xbf16>, vector<128x128xbf16>, vector<64x128xf32> -> vector<64x128xf32>
    %77 = vector.extract_strided_slice %1 {offsets = [10, 0], sizes = [1, 128], strides = [1, 1]} : vector<20x128xf32> to vector<1x128xf32>
    %78 = vector.broadcast %77 : vector<1x128xf32> to vector<64x128xf32>
    %79 = arith.mulf %78, %76 : vector<64x128xf32>
    %80 = arith.addf %73, %79 : vector<64x128xf32>
    %c11 = arith.constant 11 : index
    %c0_39 = arith.constant 0 : index
    %c0_40 = arith.constant 0 : index
    %81 = vector.load %arg3[%c11, %c0_39, %c0_40] : memref<20x64x128xbf16, #tpu.memory_space<vmem>>, vector<1x64x128xbf16>
    %82 = vector.shape_cast %81 : vector<1x64x128xbf16> to vector<64x128xbf16>
    %cst_41 = arith.constant dense<0.000000e+00> : vector<64x128xf32>
    %83 = tpu.matmul %82, %0, %cst_41 {dimension_numbers = #tpu.dot_dimension_numbers<[1], [0], [0], [1], [0, 0, 1, 1], [], []>} : vector<64x128xbf16>, vector<128x128xbf16>, vector<64x128xf32> -> vector<64x128xf32>
    %84 = vector.extract_strided_slice %1 {offsets = [11, 0], sizes = [1, 128], strides = [1, 1]} : vector<20x128xf32> to vector<1x128xf32>
    %85 = vector.broadcast %84 : vector<1x128xf32> to vector<64x128xf32>
    %86 = arith.mulf %85, %83 : vector<64x128xf32>
    %87 = arith.addf %80, %86 : vector<64x128xf32>
    %c12 = arith.constant 12 : index
    %c0_42 = arith.constant 0 : index
    %c0_43 = arith.constant 0 : index
    %88 = vector.load %arg3[%c12, %c0_42, %c0_43] : memref<20x64x128xbf16, #tpu.memory_space<vmem>>, vector<1x64x128xbf16>
    %89 = vector.shape_cast %88 : vector<1x64x128xbf16> to vector<64x128xbf16>
    %cst_44 = arith.constant dense<0.000000e+00> : vector<64x128xf32>
    %90 = tpu.matmul %89, %0, %cst_44 {dimension_numbers = #tpu.dot_dimension_numbers<[1], [0], [0], [1], [0, 0, 1, 1], [], []>} : vector<64x128xbf16>, vector<128x128xbf16>, vector<64x128xf32> -> vector<64x128xf32>
    %91 = vector.extract_strided_slice %1 {offsets = [12, 0], sizes = [1, 128], strides = [1, 1]} : vector<20x128xf32> to vector<1x128xf32>
    %92 = vector.broadcast %91 : vector<1x128xf32> to vector<64x128xf32>
    %93 = arith.mulf %92, %90 : vector<64x128xf32>
    %94 = arith.addf %87, %93 : vector<64x128xf32>
    %c13 = arith.constant 13 : index
    %c0_45 = arith.constant 0 : index
    %c0_46 = arith.constant 0 : index
    %95 = vector.load %arg3[%c13, %c0_45, %c0_46] : memref<20x64x128xbf16, #tpu.memory_space<vmem>>, vector<1x64x128xbf16>
    %96 = vector.shape_cast %95 : vector<1x64x128xbf16> to vector<64x128xbf16>
    %cst_47 = arith.constant dense<0.000000e+00> : vector<64x128xf32>
    %97 = tpu.matmul %96, %0, %cst_47 {dimension_numbers = #tpu.dot_dimension_numbers<[1], [0], [0], [1], [0, 0, 1, 1], [], []>} : vector<64x128xbf16>, vector<128x128xbf16>, vector<64x128xf32> -> vector<64x128xf32>
    %98 = vector.extract_strided_slice %1 {offsets = [13, 0], sizes = [1, 128], strides = [1, 1]} : vector<20x128xf32> to vector<1x128xf32>
    %99 = vector.broadcast %98 : vector<1x128xf32> to vector<64x128xf32>
    %100 = arith.mulf %99, %97 : vector<64x128xf32>
    %101 = arith.addf %94, %100 : vector<64x128xf32>
    %c14 = arith.constant 14 : index
    %c0_48 = arith.constant 0 : index
    %c0_49 = arith.constant 0 : index
    %102 = vector.load %arg3[%c14, %c0_48, %c0_49] : memref<20x64x128xbf16, #tpu.memory_space<vmem>>, vector<1x64x128xbf16>
    %103 = vector.shape_cast %102 : vector<1x64x128xbf16> to vector<64x128xbf16>
    %cst_50 = arith.constant dense<0.000000e+00> : vector<64x128xf32>
    %104 = tpu.matmul %103, %0, %cst_50 {dimension_numbers = #tpu.dot_dimension_numbers<[1], [0], [0], [1], [0, 0, 1, 1], [], []>} : vector<64x128xbf16>, vector<128x128xbf16>, vector<64x128xf32> -> vector<64x128xf32>
    %105 = vector.extract_strided_slice %1 {offsets = [14, 0], sizes = [1, 128], strides = [1, 1]} : vector<20x128xf32> to vector<1x128xf32>
    %106 = vector.broadcast %105 : vector<1x128xf32> to vector<64x128xf32>
    %107 = arith.mulf %106, %104 : vector<64x128xf32>
    %108 = arith.addf %101, %107 : vector<64x128xf32>
    %c15 = arith.constant 15 : index
    %c0_51 = arith.constant 0 : index
    %c0_52 = arith.constant 0 : index
    %109 = vector.load %arg3[%c15, %c0_51, %c0_52] : memref<20x64x128xbf16, #tpu.memory_space<vmem>>, vector<1x64x128xbf16>
    %110 = vector.shape_cast %109 : vector<1x64x128xbf16> to vector<64x128xbf16>
    %cst_53 = arith.constant dense<0.000000e+00> : vector<64x128xf32>
    %111 = tpu.matmul %110, %0, %cst_53 {dimension_numbers = #tpu.dot_dimension_numbers<[1], [0], [0], [1], [0, 0, 1, 1], [], []>} : vector<64x128xbf16>, vector<128x128xbf16>, vector<64x128xf32> -> vector<64x128xf32>
    %112 = vector.extract_strided_slice %1 {offsets = [15, 0], sizes = [1, 128], strides = [1, 1]} : vector<20x128xf32> to vector<1x128xf32>
    %113 = vector.broadcast %112 : vector<1x128xf32> to vector<64x128xf32>
    %114 = arith.mulf %113, %111 : vector<64x128xf32>
    %115 = arith.addf %108, %114 : vector<64x128xf32>
    %c16 = arith.constant 16 : index
    %c0_54 = arith.constant 0 : index
    %c0_55 = arith.constant 0 : index
    %116 = vector.load %arg3[%c16, %c0_54, %c0_55] : memref<20x64x128xbf16, #tpu.memory_space<vmem>>, vector<1x64x128xbf16>
    %117 = vector.shape_cast %116 : vector<1x64x128xbf16> to vector<64x128xbf16>
    %cst_56 = arith.constant dense<0.000000e+00> : vector<64x128xf32>
    %118 = tpu.matmul %117, %0, %cst_56 {dimension_numbers = #tpu.dot_dimension_numbers<[1], [0], [0], [1], [0, 0, 1, 1], [], []>} : vector<64x128xbf16>, vector<128x128xbf16>, vector<64x128xf32> -> vector<64x128xf32>
    %119 = vector.extract_strided_slice %1 {offsets = [16, 0], sizes = [1, 128], strides = [1, 1]} : vector<20x128xf32> to vector<1x128xf32>
    %120 = vector.broadcast %119 : vector<1x128xf32> to vector<64x128xf32>
    %121 = arith.mulf %120, %118 : vector<64x128xf32>
    %122 = arith.addf %115, %121 : vector<64x128xf32>
    %c17 = arith.constant 17 : index
    %c0_57 = arith.constant 0 : index
    %c0_58 = arith.constant 0 : index
    %123 = vector.load %arg3[%c17, %c0_57, %c0_58] : memref<20x64x128xbf16, #tpu.memory_space<vmem>>, vector<1x64x128xbf16>
    %124 = vector.shape_cast %123 : vector<1x64x128xbf16> to vector<64x128xbf16>
    %cst_59 = arith.constant dense<0.000000e+00> : vector<64x128xf32>
    %125 = tpu.matmul %124, %0, %cst_59 {dimension_numbers = #tpu.dot_dimension_numbers<[1], [0], [0], [1], [0, 0, 1, 1], [], []>} : vector<64x128xbf16>, vector<128x128xbf16>, vector<64x128xf32> -> vector<64x128xf32>
    %126 = vector.extract_strided_slice %1 {offsets = [17, 0], sizes = [1, 128], strides = [1, 1]} : vector<20x128xf32> to vector<1x128xf32>
    %127 = vector.broadcast %126 : vector<1x128xf32> to vector<64x128xf32>
    %128 = arith.mulf %127, %125 : vector<64x128xf32>
    %129 = arith.addf %122, %128 : vector<64x128xf32>
    %c18 = arith.constant 18 : index
    %c0_60 = arith.constant 0 : index
    %c0_61 = arith.constant 0 : index
    %130 = vector.load %arg3[%c18, %c0_60, %c0_61] : memref<20x64x128xbf16, #tpu.memory_space<vmem>>, vector<1x64x128xbf16>
    %131 = vector.shape_cast %130 : vector<1x64x128xbf16> to vector<64x128xbf16>
    %cst_62 = arith.constant dense<0.000000e+00> : vector<64x128xf32>
    %132 = tpu.matmul %131, %0, %cst_62 {dimension_numbers = #tpu.dot_dimension_numbers<[1], [0], [0], [1], [0, 0, 1, 1], [], []>} : vector<64x128xbf16>, vector<128x128xbf16>, vector<64x128xf32> -> vector<64x128xf32>
    %133 = vector.extract_strided_slice %1 {offsets = [18, 0], sizes = [1, 128], strides = [1, 1]} : vector<20x128xf32> to vector<1x128xf32>
    %134 = vector.broadcast %133 : vector<1x128xf32> to vector<64x128xf32>
    %135 = arith.mulf %134, %132 : vector<64x128xf32>
    %136 = arith.addf %129, %135 : vector<64x128xf32>
    %c19 = arith.constant 19 : index
    %c0_63 = arith.constant 0 : index
    %c0_64 = arith.constant 0 : index
    %137 = vector.load %arg3[%c19, %c0_63, %c0_64] : memref<20x64x128xbf16, #tpu.memory_space<vmem>>, vector<1x64x128xbf16>
    %138 = vector.shape_cast %137 : vector<1x64x128xbf16> to vector<64x128xbf16>
    %cst_65 = arith.constant dense<0.000000e+00> : vector<64x128xf32>
    %139 = tpu.matmul %138, %0, %cst_65 {dimension_numbers = #tpu.dot_dimension_numbers<[1], [0], [0], [1], [0, 0, 1, 1], [], []>} : vector<64x128xbf16>, vector<128x128xbf16>, vector<64x128xf32> -> vector<64x128xf32>
    %140 = vector.extract_strided_slice %1 {offsets = [19, 0], sizes = [1, 128], strides = [1, 1]} : vector<20x128xf32> to vector<1x128xf32>
    %141 = vector.broadcast %140 : vector<1x128xf32> to vector<64x128xf32>
    %142 = arith.mulf %141, %139 : vector<64x128xf32>
    %143 = arith.addf %136, %142 : vector<64x128xf32>
    %c0_66 = arith.constant 0 : index
    %c0_67 = arith.constant 0 : index
    %144 = vector.load %arg5[%c0_66, %c0_67] : memref<64x1xf32, #tpu.memory_space<vmem>>, vector<64x1xf32>
    %145 = vector.broadcast %144 : vector<64x1xf32> to vector<64x128xf32>
    %146 = arith.addf %143, %145 : vector<64x128xf32>
    %cst_68 = arith.constant 0.000000e+00 : f32
    %147 = vector.broadcast %cst_68 : f32 to vector<64x128xf32>
    %148 = arith.maximumf %146, %147 : vector<64x128xf32>
    %149 = arith.truncf %148 : vector<64x128xf32> to vector<64x128xbf16>
    %c0_69 = arith.constant 0 : index
    %c0_70 = arith.constant 0 : index
    %150 = vector.load %arg6[%c0_69, %c0_70] : memref<32x64xbf16, #tpu.memory_space<vmem>>, vector<32x64xbf16>
    %cst_71 = arith.constant dense<0.000000e+00> : vector<32x128xf32>
    %151 = tpu.matmul %150, %149, %cst_71 {dimension_numbers = #tpu.dot_dimension_numbers<[1], [0], [0], [1], [0, 0, 1, 1], [], []>} : vector<32x64xbf16>, vector<64x128xbf16>, vector<32x128xf32> -> vector<32x128xf32>
    %c0_72 = arith.constant 0 : index
    %c0_73 = arith.constant 0 : index
    %152 = vector.load %arg7[%c0_72, %c0_73] : memref<32x1xf32, #tpu.memory_space<vmem>>, vector<32x1xf32>
    %153 = vector.broadcast %152 : vector<32x1xf32> to vector<32x128xf32>
    %154 = arith.addf %151, %153 : vector<32x128xf32>
    %cst_74 = arith.constant 0.000000e+00 : f32
    %155 = vector.broadcast %cst_74 : f32 to vector<32x128xf32>
    %156 = arith.maximumf %154, %155 : vector<32x128xf32>
    %157 = arith.truncf %156 : vector<32x128xf32> to vector<32x128xbf16>
    %c0_75 = arith.constant 0 : index
    %c0_76 = arith.constant 0 : index
    %158 = vector.load %arg8[%c0_75, %c0_76] : memref<32x32xbf16, #tpu.memory_space<vmem>>, vector<32x32xbf16>
    %cst_77 = arith.constant dense<0.000000e+00> : vector<32x128xf32>
    %159 = tpu.matmul %158, %157, %cst_77 {dimension_numbers = #tpu.dot_dimension_numbers<[1], [0], [0], [1], [0, 0, 1, 1], [], []>} : vector<32x32xbf16>, vector<32x128xbf16>, vector<32x128xf32> -> vector<32x128xf32>
    %c0_78 = arith.constant 0 : index
    %c0_79 = arith.constant 0 : index
    %160 = vector.load %arg9[%c0_78, %c0_79] : memref<32x1xf32, #tpu.memory_space<vmem>>, vector<32x1xf32>
    %161 = vector.broadcast %160 : vector<32x1xf32> to vector<32x128xf32>
    %162 = arith.addf %159, %161 : vector<32x128xf32>
    %cst_80 = arith.constant 0.000000e+00 : f32
    %163 = vector.broadcast %cst_80 : f32 to vector<32x128xf32>
    %164 = arith.maximumf %162, %163 : vector<32x128xf32>
    %165 = arith.truncf %164 : vector<32x128xf32> to vector<32x128xbf16>
    %c0_81 = arith.constant 0 : index
    %c0_82 = arith.constant 0 : index
    %166 = vector.load %arg10[%c0_81, %c0_82] : memref<32x32xbf16, #tpu.memory_space<vmem>>, vector<32x32xbf16>
    %cst_83 = arith.constant dense<0.000000e+00> : vector<32x128xf32>
    %167 = tpu.matmul %166, %165, %cst_83 {dimension_numbers = #tpu.dot_dimension_numbers<[1], [0], [0], [1], [0, 0, 1, 1], [], []>} : vector<32x32xbf16>, vector<32x128xbf16>, vector<32x128xf32> -> vector<32x128xf32>
    %c0_84 = arith.constant 0 : index
    %c0_85 = arith.constant 0 : index
    %168 = vector.load %arg11[%c0_84, %c0_85] : memref<32x1xf32, #tpu.memory_space<vmem>>, vector<32x1xf32>
    %169 = vector.broadcast %168 : vector<32x1xf32> to vector<32x128xf32>
    %170 = arith.addf %167, %169 : vector<32x128xf32>
    %c0_86 = arith.constant 0 : index
    %c0_87 = arith.constant 0 : index
    %171 = vector.load %arg12[%c0_86, %c0_87] : memref<32x128xf32, #tpu.memory_space<vmem>>, vector<32x128xf32>
    tpu.vector_store %arg12[%c0_86, %c0_87], %170 {strides = array<i32>} : memref<32x128xf32, #tpu.memory_space<vmem>>, vector<32x128xf32>,
    return
  }
  func.func @transform_0(%arg0: i32) -> (i32, i32) {
    %c0_i32 = arith.constant 0 : i32
    %c0_i32_0 = arith.constant 0 : i32
    return %c0_i32, %arg0 : i32, i32
  }
  func.func @transform_1(%arg0: i32) -> (i32, i32) {
    %c0_i32 = arith.constant 0 : i32
    %c0_i32_0 = arith.constant 0 : i32
    return %c0_i32, %arg0 : i32, i32
  }
  func.func @transform_2(%arg0: i32) -> (i32, i32, i32) {
    %c0_i32 = arith.constant 0 : i32
    %c0_i32_0 = arith.constant 0 : i32
    %c0_i32_1 = arith.constant 0 : i32
    %c0_i32_2 = arith.constant 0 : i32
    return %c0_i32, %c0_i32_0, %c0_i32_1 : i32, i32, i32
  }
  func.func @transform_3(%arg0: i32) -> (i32, i32) {
    %c0_i32 = arith.constant 0 : i32
    %c0_i32_0 = arith.constant 0 : i32
    %c0_i32_1 = arith.constant 0 : i32
    return %c0_i32, %c0_i32_0 : i32, i32
  }
  func.func @transform_4(%arg0: i32) -> (i32, i32) {
    %c0_i32 = arith.constant 0 : i32
    %c0_i32_0 = arith.constant 0 : i32
    %c0_i32_1 = arith.constant 0 : i32
    return %c0_i32, %c0_i32_0 : i32, i32
  }
  func.func @transform_5(%arg0: i32) -> (i32, i32) {
    %c0_i32 = arith.constant 0 : i32
    %c0_i32_0 = arith.constant 0 : i32
    %c0_i32_1 = arith.constant 0 : i32
    return %c0_i32, %c0_i32_0 : i32, i32
  }
  func.func @transform_6(%arg0: i32) -> (i32, i32) {
    %c0_i32 = arith.constant 0 : i32
    %c0_i32_0 = arith.constant 0 : i32
    %c0_i32_1 = arith.constant 0 : i32
    return %c0_i32, %c0_i32_0 : i32, i32
  }
  func.func @transform_7(%arg0: i32) -> (i32, i32) {
    %c0_i32 = arith.constant 0 : i32
    %c0_i32_0 = arith.constant 0 : i32
    %c0_i32_1 = arith.constant 0 : i32
    return %c0_i32, %c0_i32_0 : i32, i32
  }
  func.func @transform_8(%arg0: i32) -> (i32, i32) {
    %c0_i32 = arith.constant 0 : i32
    %c0_i32_0 = arith.constant 0 : i32
    %c0_i32_1 = arith.constant 0 : i32
    return %c0_i32, %c0_i32_0 : i32, i32
  }
  func.func @transform_9(%arg0: i32) -> (i32, i32) {
    %c0_i32 = arith.constant 0 : i32
    %c0_i32_0 = arith.constant 0 : i32
    %c0_i32_1 = arith.constant 0 : i32
    return %c0_i32, %c0_i32_0 : i32, i32
  }
  func.func @transform_10(%arg0: i32) -> (i32, i32) {
    %c0_i32 = arith.constant 0 : i32
    %c0_i32_0 = arith.constant 0 : i32
    %c0_i32_1 = arith.constant 0 : i32
    return %c0_i32, %c0_i32_0 : i32, i32
  }
  func.func @transform_11(%arg0: i32) -> (i32, i32) {
    %c0_i32 = arith.constant 0 : i32
    %c0_i32_0 = arith.constant 0 : i32
    return %c0_i32, %arg0 : i32, i32
  }
}

</mosaic_0001>

<bundles_post_ra>
// kernel: tpu_custom_call.1
= control target key start
LH: loop header
LB: loop body
LE: loop exit
PB: predicated region body
PF: predicated region fallthrough
CT: control target
= control target key end

     0   :  { %16 = vsyncpa [#allocation3], 0  ;;  %s4858_s0 = inlined_call_operand.vmem [shape: bf16[128,128], index: 0, kind: input, shape index: {}]   ;;  %s4859_s1 = inlined_call_operand.vmem [shape: f32[20,128], index: 1, kind: input, shape index: {}]   ;;  %s4860_s2 = inlined_call_operand.hbm [shape: bf16[20,64,128], index: 2, kind: input, shape index: {}]   ;;  %s4861_s3 = inlined_call_operand.vmem [shape: f32[64,20], index: 3, kind: input, shape index: {}]   ;;  %s4862_s4 = inlined_call_operand.vmem [shape: f32[64,1], index: 4, kind: input, shape index: {}]   ;;  %s4863_s5 = inlined_call_operand.vmem [shape: bf16[32,64], index: 5, kind: input, shape index: {}]   ;;  %s4864_s6 = inlined_call_operand.vmem [shape: f32[32,1], index: 6, kind: input, shape index: {}]   ;;  %s4865_s7 = inlined_call_operand.vmem [shape: bf16[32,32], index: 7, kind: input, shape index: {}]   ;;  %s4866_s8 = inlined_call_operand.vmem [shape: f32[32,1], index: 8, kind: input, shape index: {}]   ;;  %s4867_s9 = inlined_call_operand.vmem [shape: bf16[32,32], index: 9, kind: input, shape index: {}]   ;;  %s4868_s10 = inlined_call_operand.vmem [shape: f32[32,1], index: 10, kind: input, shape index: {}]   ;;  %s4869_s11 = inlined_call_operand.hbm [shape: f32[32,128], index: 11, kind: output, shape index: {}]  }
   0x1   :  { %17 = vsyncpa [#allocation4], 0  ;;  %s4062_s17 = smov [#allocation2]   ;;  %s4014_s21 = scalar_lea.hbm %s4860_s2, 10240 }
   0x2   :  { %s27_s18 = sshll.u32 %s4062_s17, 4  ;;  %p4015_p0 = scmp.ne.s32.totalorder %s4860_s2, %s4014_s21  ;;  %s28_s18 = int_to_ptr.vmem [resolvable:$true] %s27_s18 }
   0x3   :  { %p4018_p1 = scmp.lt.u32.totalorder %s4014_s21, %s4860_s2 }
   0x5   :  { %p4020_p2 = pnand %p4018_p1, %p4015_p0 }
   0x7   :  { %4023 = shalt.err (!%p4020_p2)
}
   0x8   :  { %s4024_s26 = scalar_lea.vmem %s28_s18, 10240  ;;  %p4029_p4 = scmp.lt.s32.totalorder %s28_s18, %s28_s18 }
   0x9   :  { %p4025_p3 = scmp.ne.s32.totalorder %s28_s18, %s4024_s26  ;;  %p4030_p5 = scmp.lt.s32.totalorder %s4024_s26, %s4024_s26 }
   0xb   :  { %p4031_p6 = por %p4030_p5, %p4029_p4 }
   0xd   :  { %p4032_p7 = pnand %p4031_p6, %p4025_p3 }
   0xf   :  { %4035 = shalt.err (!%p4032_p7)
}
  0x10   :  { %s4063_s27 = smov 64   ;;  %s4064_s28 = smov 4  }
  0x11   :  { %33 = dma.hbm_to_vmem [thread:$0]  %s4860_s2, 10240, %s28_s18, [#allocation3], %s4063_s27, %s4063_s27, %s4064_s28  }
  0x12   :  { %4058 = dma.done.wait [#allocation3], 10240  }
  0x13   :  { %4059 = vsyncadd [#allocation3], 4294957056  ;;  %v4144_v0 = vld [vmem:[%s4858_s0] sm:$0xff]   ;;  %v71_v2 = vld [vmem:[%s4859_s1 + $0x8] sm:$0xff]  ;;  %vm238_vm0 = vcmask 162816   ;;  %vm263_vm1 = vcmask 1043456  }
  0x14   :  { %v70_v1 = vld [vmem:[%s4859_s1] sm:$0xff]  ;;  %3370 = vmatprep.subr.bf16.mxu0 %v4144_v0  ;;  %v4156_v4 = vld [vmem:[%s4858_s0 + $0x8] sm:$0xff]   ;;  %v72_v5 = vld [vmem:[%s4859_s1 + $0x10] sm:$0xf]  ;;  %vm2720_vm2 = vcmask 523264   ;;  %vm2820_vm3 = vcmask 261120  }
  0x15   :  { %v3896_v3 = vpack.c.bf16 %v71_v2, %v70_v1  ;;  %3371 = vmatpush3.bf16.msra.mxu0 %v4144_v0  ;;  %v73_v6 = vld [vmem:[%s4861_s3] sm:$0xff]  ;;  %v4169_v7 = vld [vmem:[%s4858_s0 + $0x10] sm:$0xff]   ;;  %v74_v8 = vld [vmem:[%s4861_s3 + $0x8] sm:$0xff]  ;;  %s4066_s27 = smov [#allocation5]  }
  0x16   :  { %3372 = vmatprep.subr.bf16.mxu0 %v4156_v4  ;;  %3400 = vmatprep.mubr.msk.f32.mxu1 %vm238_vm0, %v73_v6  ;;  %v4180_v9 = vld [vmem:[%s4858_s0 + $0x18] sm:$0xff]   ;;  %v75_v10 = vld [vmem:[%s4861_s3 + $0x10] sm:$0xff]  ;;  %v3917_v12 = vld [vmem:[#allocation2] sm:$0xff]   ;;  %s2984_s28 = sshll.u32 %s4066_s27, 4  ;;  %s2985_s28 = int_to_ptr.vmem [resolvable:$true] %s2984_s28 }
  0x17   :  { %3897 = vmatprep.subr.bf16.mxu1 %v3896_v3  ;;  %v76_v11 = vld [vmem:[%s4861_s3 + $0x18] sm:$0xff]  ;;  %v4197_v13 = vld [vmem:[%s4858_s0 + $0x20] sm:$0xff]   ;;  %3386 = vmatprep.mubr.bf16.mxu0 %v3917_v12  ;;  %v78_v15 = vld [vmem:[%s4861_s3 + $0x28] sm:$0xff]  ;;  %p4041_p9 = scmp.lt.s32.totalorder %s2985_s28, %s2985_s28 }
  0x18   :  { %3899 = vmatpush3.bf16.msra.mxu1 %v3896_v3  ;;  %v77_v14 = vld [vmem:[%s4861_s3 + $0x20] sm:$0xff]  ;;  %v4214_v16 = vld [vmem:[%s4858_s0 + $0x28] sm:$0xff]   ;;  %v79_v17 = vld [vmem:[%s4861_s3 + $0x30] sm:$0xff] }
  0x19   :  { %3398 = vmatprep.subr.msk.mxu1 %vm263_vm1, %v72_v5  ;;  %3373 = vmatpush3.bf16.msra.mxu0 %v4156_v4  ;;  %v80_v18 = vld [vmem:[%s4861_s3 + $0x38] sm:$0xff]  ;;  %v4231_v19 = vld [vmem:[%s4858_s0 + $0x30] sm:$0xff]   ;;  %v3919_v20 = vld [vmem:[#allocation2 + $0x20] sm:$0xff]  }
  0x1a   :  { %3374 = vmatprep.subr.bf16.mxu0 %v4169_v7  ;;  %v4242_v21 = vld [vmem:[%s4858_s0 + $0x38] sm:$0xff]   ;;  %v3918_v22 = vld [vmem:[#allocation2 + $0x8] sm:$0xff]   ;;  %v3921_v23 = vld [vmem:[#allocation2 + $0x10] sm:$0xff]  }
  0x1b   :  { %v3920_v24 = vld [vmem:[#allocation2 + $0x28] sm:$0xff]   ;;  %v3922_v25 = vld [vmem:[#allocation2 + $0x18] sm:$0xff]   ;;  %v3923_v26 = vld [vmem:[#allocation2 + $0x30] sm:$0xff]  }
  0x1c   :  { %3399 = vmatpush3.msk.msra.mxu1 %vm263_vm1, %v72_v5  ;;  %v3925_v27 = vld [vmem:[#allocation2 + $0x40] sm:$0xff]   ;;  %v3924_v28 = vld [vmem:[#allocation2 + $0x38] sm:$0xff]   ;;  %v3926_v30 = vld [vmem:[#allocation2 + $0x48] sm:$0xff]  }
  0x1d   :  { %3401 = vmatmul.mubr.msk.f32.vlgmr.msra.gmra.mrb[0].mxu1 %vm238_vm0, %v74_v8  ;;  %3412 = vmatprep.subr.bf16.mxu1 %v4144_v0  ;;  %v3927_v29 = vld [vmem:[#allocation2 + $0x60] sm:$0xff]   ;;  %v3929_v31 = vld [vmem:[#allocation2 + $0x50] sm:$0xff]   ;;  %v3928_v32 = vld [vmem:[#allocation2 + $0x68] sm:$0xff]  }
  0x1e   :  { %3413 = vmatpush3.bf16.msra.mxu1 %v4144_v0  ;;  %3375 = vmatpush3.bf16.msra.mxu0 %v4169_v7  ;;  %v3930_v33 = vld [vmem:[#allocation2 + $0x58] sm:$0xff]   ;;  %v3931_v34 = vld [vmem:[#allocation2 + $0x70] sm:$0xff]   ;;  %v3933_v35 = vld [vmem:[#allocation2 + $0x80] sm:$0xff]  }
  0x1f   :  { %3414 = vmatprep.subr.bf16.mxu1 %v4156_v4  ;;  %3376 = vmatprep.subr.bf16.mxu0 %v4180_v9  ;;  %v3932_v36 = vld [vmem:[#allocation2 + $0x78] sm:$0xff]   ;;  %v3935_v37 = vld [vmem:[#allocation2 + $0xa0] sm:$0xff]   ;;  %v3934_v38 = vld [vmem:[#allocation2 + $0x88] sm:$0xff]  }
  0x20   :  { %3403 = vmatprep.mubr.msk.f32.mxu1 %vm238_vm0, %v75_v10  ;;  %v3937_v39 = vld [vmem:[#allocation2 + $0x90] sm:$0xff]   ;;  %v3936_v40 = vld [vmem:[#allocation2 + $0xa8] sm:$0xff]   ;;  %v3938_v41 = vld [vmem:[#allocation2 + $0x98] sm:$0xff]  }
  0x21   :  { %3404 = vmatmul.mubr.msk.f32.gmra.mrb[2].mxu1 %vm238_vm0, %v76_v11  ;;  %v3939_v42 = vld [vmem:[#allocation2 + $0xb0] sm:$0xff]   ;;  %v3941_v43 = vld [vmem:[#allocation2 + $0xc0] sm:$0xff]   ;;  %v3940_v44 = vld [vmem:[#allocation2 + $0xb8] sm:$0xff]  }
  0x22   :  { %3415 = vmatpush3.bf16.msra.mxu1 %v4156_v4  ;;  %3377 = vmatpush3.bf16.msra.mxu0 %v4180_v9  ;;  %v3943_v45 = vld [vmem:[#allocation2 + $0xe0] sm:$0xff]   ;;  %v3942_v46 = vld [vmem:[#allocation2 + $0xc8] sm:$0xff]   ;;  %v3945_v47 = vld [vmem:[#allocation2 + $0xd0] sm:$0xff]  }
  0x23   :  { %3416 = vmatprep.subr.bf16.mxu1 %v4169_v7  ;;  %3378 = vmatprep.subr.bf16.mxu0 %v4197_v13  ;;  %v3944_v48 = vld [vmem:[#allocation2 + $0xe8] sm:$0xff]   ;;  %v3946_v49 = vld [vmem:[#allocation2 + $0xd8] sm:$0xff]   ;;  %v3947_v50 = vld [vmem:[#allocation2 + $0xf0] sm:$0xff]  }
  0x24   :  { %3406 = vmatprep.mubr.msk.f32.mxu1 %vm238_vm0, %v77_v14  ;;  %v3949_v51 = vld [vmem:[#allocation2 + $0x100] sm:$0xff]   ;;  %v3948_v52 = vld [vmem:[#allocation2 + $0xf8] sm:$0xff]   ;;  %v3950_v54 = vld [vmem:[#allocation2 + $0x108] sm:$0xff]  }
  0x25   :  { %3407 = vmatmul.mubr.msk.f32.gmra.mrb[4].mxu1 %vm238_vm0, %v78_v15  ;;  %v3951_v53 = vld [vmem:[#allocation2 + $0x120] sm:$0xff]   ;;  %v3953_v55 = vld [vmem:[#allocation2 + $0x110] sm:$0xff]   ;;  %v3952_v56 = vld [vmem:[#allocation2 + $0x128] sm:$0xff]   ;;  %v226_v15 = vlaneseq }
  0x26   :  { %3417 = vmatpush3.bf16.msra.mxu1 %v4169_v7  ;;  %3379 = vmatpush3.bf16.msra.mxu0 %v4197_v13  ;;  %v3954_v57 = vld [vmem:[#allocation2 + $0x118] sm:$0xff]   ;;  %v3955_v58 = vld [vmem:[#allocation2 + $0x130] sm:$0xff]   ;;  %v3957_v59 = vld [vmem:[#allocation2 + $0x140] sm:$0xff]  }
  0x27   :  { %3418 = vmatprep.subr.bf16.mxu1 %v4180_v9  ;;  %3380 = vmatprep.subr.bf16.mxu0 %v4214_v16  ;;  %v3956_v60 = vld [vmem:[#allocation2 + $0x138] sm:$0xff]   ;;  %v3959_v61 = vld [vmem:[#allocation2 + $0x160] sm:$0xff]   ;;  %v3958_v62 = vld [vmem:[#allocation2 + $0x148] sm:$0xff]  }
  0x28   :  { %3409 = vmatprep.mubr.msk.f32.mxu1 %vm238_vm0, %v79_v17  ;;  %v3961_v63 = vld [vmem:[#allocation2 + $0x150] sm:$0xff]   ;;  %v3960_v1 = vld [vmem:[#allocation2 + $0x168] sm:$0xff]   ;;  %v3962_v2 = vld [vmem:[#allocation2 + $0x158] sm:$0xff]  }
  0x29   :  { %3410 = vmatmul.mubr.msk.f32.gmra.mrb[6].mxu1 %vm238_vm0, %v80_v18  ;;  %v3963_v3 = vld [vmem:[#allocation2 + $0x170] sm:$0xff]   ;;  %v3965_v5 = vld [vmem:[#allocation2 + $0x180] sm:$0xff]   ;;  %v4432_v8 = vld [vmem:[%s4858_s0 + $0x8] sm:$0xff]  }
  0x2a   :  { %3419 = vmatpush3.bf16.msra.mxu1 %v4180_v9  ;;  %3381 = vmatpush3.bf16.msra.mxu0 %v4214_v16  ;;  %v4423_v6 = vld [vmem:[%s4858_s0] sm:$0xff]   ;;  %v3966_v11 = vld [vmem:[#allocation2 + $0x188] sm:$0xff]   ;;  %v3970_v17 = vld [vmem:[#allocation2 + $0x198] sm:$0xff]  }
  0x2b   :  { %3420 = vmatprep.subr.bf16.mxu1 %v4197_v13  ;;  %3382 = vmatprep.subr.bf16.mxu0 %v4231_v19  ;;  %v3967_v10 = vld [vmem:[#allocation2 + $0x1a0] sm:$0xff]  }
  0x2c   :  { %3428 = vmatprep.mubr.bf16.mxu1 %v3919_v20  ;;  %v3971_v20 = vld [vmem:[#allocation2 + $0x1b0] sm:$0xff]  }
  0x2e   :  { %3421 = vmatpush3.bf16.msra.mxu1 %v4197_v13  ;;  %3383 = vmatpush3.bf16.msra.mxu0 %v4231_v19 }
  0x2f   :  { %3422 = vmatprep.subr.bf16.mxu1 %v4214_v16  ;;  %3384 = vmatprep.subr.bf16.mxu0 %v4242_v21 }
  0x32   :  { %3423 = vmatpush3.bf16.msra.mxu1 %v4214_v16  ;;  %3385 = vmatpush3.bf16.msra.mxu0 %v4242_v21 }
  0x33   :  { %3424 = vmatprep.subr.bf16.mxu1 %v4231_v19  ;;  %3436 = vmatprep.subr.bf16.mxu0 %v4144_v0 }
  0x35   :  { %3387 = vmatmul.mubr.bf16.vlgmr.msra.gmra.mrb[0].mxu0 %v3918_v22 }
  0x36   :  { %3425 = vmatpush3.bf16.msra.mxu1 %v4231_v19  ;;  %3437 = vmatpush3.bf16.msra.mxu0 %v4144_v0 }
  0x37   :  { %3426 = vmatprep.subr.bf16.mxu1 %v4242_v21  ;;  %3438 = vmatprep.subr.bf16.mxu0 %v4156_v4 }
  0x38   :  { %3390 = vmatprep.mubr.bf16.mxu0 %v3921_v23  ;;  %v3973_v23 = vld [vmem:[#allocation2 + $0x1c0] sm:$0xff]  }
  0x3a   :  { %3427 = vmatpush3.bf16.msra.mxu1 %v4242_v21  ;;  %3439 = vmatpush3.bf16.msra.mxu0 %v4156_v4 }
  0x3b   :  { %3460 = vmatprep.subr.bf16.mxu1 %v4144_v0  ;;  %3440 = vmatprep.subr.bf16.mxu0 %v4169_v7 }
  0x3d   :  { %3429 = vmatmul.mubr.bf16.vlgmr.msra.gmra.mrb[8].mxu1 %v3920_v24  ;;  %3391 = vmatmul.mubr.bf16.gmra.mrb[4].mxu0 %v3922_v25  ;;  %v4479_v24 = vshrl.u32 %v226_v15, 7  ;;  %v4489_v25 = vld [vmem:[%s4858_s0 + $0x18] sm:$0xff]   ;;  %v2615_v15 = vld [vmem:[%s4862_s4 + $0x8] sm:$0xff] }
  0x3e   :  { %3461 = vmatpush3.bf16.msra.mxu1 %v4144_v0  ;;  %3441 = vmatpush3.bf16.msra.mxu0 %v4169_v7 }
  0x3f   :  { %3462 = vmatprep.subr.bf16.mxu1 %v4156_v4  ;;  %3442 = vmatprep.subr.bf16.mxu0 %v4180_v9 }
  0x40   :  { %3432 = vmatprep.mubr.bf16.mxu1 %v3923_v26  ;;  %3452 = vmatprep.mubr.bf16.mxu0 %v3925_v27  ;;  %v4493_v26 = vsub.s32 0, %v4479_v24  ;;  %v3972_v27 = vld [vmem:[#allocation2 + $0x1b8] sm:$0xff]  }
  0x42   :  { %3463 = vmatpush3.bf16.msra.mxu1 %v4156_v4  ;;  %3443 = vmatpush3.bf16.msra.mxu0 %v4180_v9 }
  0x43   :  { %3464 = vmatprep.subr.bf16.mxu1 %v4169_v7  ;;  %3444 = vmatprep.subr.bf16.mxu0 %v4197_v13 }
  0x45   :  { %3433 = vmatmul.mubr.bf16.gmra.mrb[12].mxu1 %v3924_v28  ;;  %v4501_v28 = vld [vmem:[%s4858_s0 + $0x20] sm:$0xff]  }
  0x46   :  { %3465 = vmatpush3.bf16.msra.mxu1 %v4169_v7  ;;  %3445 = vmatpush3.bf16.msra.mxu0 %v4197_v13 }
  0x47   :  { %3466 = vmatprep.subr.bf16.mxu1 %v4180_v9  ;;  %3446 = vmatprep.subr.bf16.mxu0 %v4214_v16 }
  0x48   :  { %3476 = vmatprep.mubr.bf16.mxu1 %v3927_v29  ;;  %v3975_v29 = vld [vmem:[#allocation2 + $0x1e0] sm:$0xff]  }
  0x4a   :  { %3467 = vmatpush3.bf16.msra.mxu1 %v4180_v9  ;;  %3447 = vmatpush3.bf16.msra.mxu0 %v4214_v16 }
  0x4b   :  { %3468 = vmatprep.subr.bf16.mxu1 %v4197_v13  ;;  %3448 = vmatprep.subr.bf16.mxu0 %v4231_v19 }
  0x4e   :  { %3469 = vmatpush3.bf16.msra.mxu1 %v4197_v13  ;;  %3449 = vmatpush3.bf16.msra.mxu0 %v4231_v19 }
  0x4f   :  { %3470 = vmatprep.subr.bf16.mxu1 %v4214_v16  ;;  %3450 = vmatprep.subr.bf16.mxu0 %v4242_v21 }
  0x52   :  { %3471 = vmatpush3.bf16.msra.mxu1 %v4214_v16  ;;  %3451 = vmatpush3.bf16.msra.mxu0 %v4242_v21 }
  0x53   :  { %3472 = vmatprep.subr.bf16.mxu1 %v4231_v19  ;;  %3484 = vmatprep.subr.bf16.mxu0 %v4144_v0 }
  0x55   :  { %3453 = vmatmul.mubr.bf16.vlgmr.msra.gmra.mrb[8].mxu0 %v3926_v30  ;;  %v4507_v30 = vld [vmem:[%s4859_s1] sm:$0xff] }
  0x56   :  { %3473 = vmatpush3.bf16.msra.mxu1 %v4231_v19  ;;  %3485 = vmatpush3.bf16.msra.mxu0 %v4144_v0 }
  0x57   :  { %3474 = vmatprep.subr.bf16.mxu1 %v4242_v21  ;;  %3486 = vmatprep.subr.bf16.mxu0 %v4156_v4 }
  0x58   :  { %3456 = vmatprep.mubr.bf16.mxu0 %v3929_v31  ;;  %v229_v31 = vrot.slane %v4507_v30, %v4493_v26 }
  0x5a   :  { %3475 = vmatpush3.bf16.msra.mxu1 %v4242_v21  ;;  %3487 = vmatpush3.bf16.msra.mxu0 %v4156_v4 }
  0x5b   :  { %3508 = vmatprep.subr.bf16.mxu1 %v4144_v0  ;;  %3488 = vmatprep.subr.bf16.mxu0 %v4169_v7 }
  0x5d   :  { %3477 = vmatmul.mubr.bf16.vlgmr.msra.gmra.mrb[16].mxu1 %v3928_v32  ;;  %3457 = vmatmul.mubr.bf16.gmra.mrb[12].mxu0 %v3930_v33  ;;  %v4517_v32 = vld [vmem:[%s4858_s0 + $0x28] sm:$0xff]  }
  0x5e   :  { %3509 = vmatpush3.bf16.msra.mxu1 %v4144_v0  ;;  %3489 = vmatpush3.bf16.msra.mxu0 %v4169_v7 }
  0x5f   :  { %3510 = vmatprep.subr.bf16.mxu1 %v4156_v4  ;;  %3490 = vmatprep.subr.bf16.mxu0 %v4180_v9 }
  0x60   :  { %3480 = vmatprep.mubr.bf16.mxu1 %v3931_v34  ;;  %3500 = vmatprep.mubr.bf16.mxu0 %v3933_v35  ;;  %v4521_v34 = vsub.s32 1, %v4479_v24 }
  0x62   :  { %3511 = vmatpush3.bf16.msra.mxu1 %v4156_v4  ;;  %3491 = vmatpush3.bf16.msra.mxu0 %v4180_v9 }
  0x63   :  { %3512 = vmatprep.subr.bf16.mxu1 %v4169_v7  ;;  %3492 = vmatprep.subr.bf16.mxu0 %v4197_v13 }
  0x65   :  { %3481 = vmatmul.mubr.bf16.gmra.mrb[20].mxu1 %v3932_v36 }
  0x66   :  { %3513 = vmatpush3.bf16.msra.mxu1 %v4169_v7  ;;  %3493 = vmatpush3.bf16.msra.mxu0 %v4197_v13 }
  0x67   :  { %3514 = vmatprep.subr.bf16.mxu1 %v4180_v9  ;;  %3494 = vmatprep.subr.bf16.mxu0 %v4214_v16 }
  0x68   :  { %3524 = vmatprep.mubr.bf16.mxu1 %v3935_v37 }
  0x6a   :  { %3515 = vmatpush3.bf16.msra.mxu1 %v4180_v9  ;;  %3495 = vmatpush3.bf16.msra.mxu0 %v4214_v16 }
  0x6b   :  { %3516 = vmatprep.subr.bf16.mxu1 %v4197_v13  ;;  %3496 = vmatprep.subr.bf16.mxu0 %v4231_v19 }
  0x6e   :  { %3517 = vmatpush3.bf16.msra.mxu1 %v4197_v13  ;;  %3497 = vmatpush3.bf16.msra.mxu0 %v4231_v19 }
  0x6f   :  { %3518 = vmatprep.subr.bf16.mxu1 %v4214_v16  ;;  %3498 = vmatprep.subr.bf16.mxu0 %v4242_v21 }
  0x72   :  { %3519 = vmatpush3.bf16.msra.mxu1 %v4214_v16  ;;  %3499 = vmatpush3.bf16.msra.mxu0 %v4242_v21 }
  0x73   :  { %3520 = vmatprep.subr.bf16.mxu1 %v4231_v19  ;;  %3532 = vmatprep.subr.bf16.mxu0 %v4144_v0 }
  0x75   :  { %3501 = vmatmul.mubr.bf16.vlgmr.msra.gmra.mrb[16].mxu0 %v3934_v38 }
  0x76   :  { %3521 = vmatpush3.bf16.msra.mxu1 %v4231_v19  ;;  %3533 = vmatpush3.bf16.msra.mxu0 %v4144_v0 }
  0x77   :  { %3522 = vmatprep.subr.bf16.mxu1 %v4242_v21  ;;  %3534 = vmatprep.subr.bf16.mxu0 %v4156_v4 }
  0x78   :  { %3504 = vmatprep.mubr.bf16.mxu0 %v3937_v39 }
  0x7a   :  { %3523 = vmatpush3.bf16.msra.mxu1 %v4242_v21  ;;  %3535 = vmatpush3.bf16.msra.mxu0 %v4156_v4 }
  0x7b   :  { %3556 = vmatprep.subr.bf16.mxu1 %v4144_v0  ;;  %3536 = vmatprep.subr.bf16.mxu0 %v4169_v7 }
  0x7d   :  { %3525 = vmatmul.mubr.bf16.vlgmr.msra.gmra.mrb[24].mxu1 %v3936_v40  ;;  %3505 = vmatmul.mubr.bf16.gmra.mrb[20].mxu0 %v3938_v41 }
  0x7e   :  { %3557 = vmatpush3.bf16.msra.mxu1 %v4144_v0  ;;  %3537 = vmatpush3.bf16.msra.mxu0 %v4169_v7 }
  0x7f   :  { %3558 = vmatprep.subr.bf16.mxu1 %v4156_v4  ;;  %3538 = vmatprep.subr.bf16.mxu0 %v4180_v9 }
  0x80   :  { %3528 = vmatprep.mubr.bf16.mxu1 %v3939_v42  ;;  %3548 = vmatprep.mubr.bf16.mxu0 %v3941_v43  ;;  %v4529_v42 = vld [vmem:[%s4858_s0 + $0x30] sm:$0xff]  }
  0x82   :  { %3559 = vmatpush3.bf16.msra.mxu1 %v4156_v4  ;;  %3539 = vmatpush3.bf16.msra.mxu0 %v4180_v9 }
  0x83   :  { %3560 = vmatprep.subr.bf16.mxu1 %v4169_v7  ;;  %3540 = vmatprep.subr.bf16.mxu0 %v4197_v13 }
  0x85   :  { %3529 = vmatmul.mubr.bf16.gmra.mrb[28].mxu1 %v3940_v44 }
  0x86   :  { %3561 = vmatpush3.bf16.msra.mxu1 %v4169_v7  ;;  %3541 = vmatpush3.bf16.msra.mxu0 %v4197_v13 }
  0x87   :  { %3562 = vmatprep.subr.bf16.mxu1 %v4180_v9  ;;  %3542 = vmatprep.subr.bf16.mxu0 %v4214_v16 }
  0x88   :  { %3572 = vmatprep.mubr.bf16.mxu1 %v3943_v45  ;;  %v4535_v45 = vrot.slane %v4507_v30, %v4521_v34 }
  0x8a   :  { %3563 = vmatpush3.bf16.msra.mxu1 %v4180_v9  ;;  %3543 = vmatpush3.bf16.msra.mxu0 %v4214_v16 }
  0x8b   :  { %3564 = vmatprep.subr.bf16.mxu1 %v4197_v13  ;;  %3544 = vmatprep.subr.bf16.mxu0 %v4231_v19 }
  0x8e   :  { %3565 = vmatpush3.bf16.msra.mxu1 %v4197_v13  ;;  %3545 = vmatpush3.bf16.msra.mxu0 %v4231_v19 }
  0x8f   :  { %3566 = vmatprep.subr.bf16.mxu1 %v4214_v16  ;;  %3546 = vmatprep.subr.bf16.mxu0 %v4242_v21 }
  0x92   :  { %3567 = vmatpush3.bf16.msra.mxu1 %v4214_v16  ;;  %3547 = vmatpush3.bf16.msra.mxu0 %v4242_v21 }
  0x93   :  { %3568 = vmatprep.subr.bf16.mxu1 %v4231_v19  ;;  %3580 = vmatprep.subr.bf16.mxu0 %v4144_v0 }
  0x95   :  { %3549 = vmatmul.mubr.bf16.vlgmr.msra.gmra.mrb[24].mxu0 %v3942_v46 }
  0x96   :  { %3569 = vmatpush3.bf16.msra.mxu1 %v4231_v19  ;;  %3581 = vmatpush3.bf16.msra.mxu0 %v4144_v0 }
  0x97   :  { %3570 = vmatprep.subr.bf16.mxu1 %v4242_v21  ;;  %3582 = vmatprep.subr.bf16.mxu0 %v4156_v4 }
  0x98   :  { %3552 = vmatprep.mubr.bf16.mxu0 %v3945_v47 }
  0x9a   :  { %3571 = vmatpush3.bf16.msra.mxu1 %v4242_v21  ;;  %3583 = vmatpush3.bf16.msra.mxu0 %v4156_v4 }
  0x9b   :  { %3604 = vmatprep.subr.bf16.mxu1 %v4144_v0  ;;  %3584 = vmatprep.subr.bf16.mxu0 %v4169_v7 }
  0x9d   :  { %3573 = vmatmul.mubr.bf16.vlgmr.msra.gmra.mrb[32].mxu1 %v3944_v48  ;;  %3553 = vmatmul.mubr.bf16.gmra.mrb[28].mxu0 %v3946_v49  ;;  %v2614_v48 = vld [vmem:[%s4862_s4] sm:$0xff]  ;;  %v4548_v49 = vld [vmem:[%s4858_s0 + $0x38] sm:$0xff]  }
  0x9e   :  { %3605 = vmatpush3.bf16.msra.mxu1 %v4144_v0  ;;  %3585 = vmatpush3.bf16.msra.mxu0 %v4169_v7 }
  0x9f   :  { %3606 = vmatprep.subr.bf16.mxu1 %v4156_v4  ;;  %3586 = vmatprep.subr.bf16.mxu0 %v4180_v9 }
  0xa0   :  { %3576 = vmatprep.mubr.bf16.mxu1 %v3947_v50  ;;  %3596 = vmatprep.mubr.bf16.mxu0 %v3949_v51 }
  0xa2   :  { %3607 = vmatpush3.bf16.msra.mxu1 %v4156_v4  ;;  %3587 = vmatpush3.bf16.msra.mxu0 %v4180_v9 }
  0xa3   :  { %3608 = vmatprep.subr.bf16.mxu1 %v4169_v7  ;;  %3588 = vmatprep.subr.bf16.mxu0 %v4197_v13 }
  0xa5   :  { %3577 = vmatmul.mubr.bf16.gmra.mrb[36].mxu1 %v3948_v52  ;;  %v4065_v52 = vmov 0  }
  0xa6   :  { %3609 = vmatpush3.bf16.msra.mxu1 %v4169_v7  ;;  %3589 = vmatpush3.bf16.msra.mxu0 %v4197_v13 }
  0xa7   :  { %3610 = vmatprep.subr.bf16.mxu1 %v4180_v9  ;;  %3590 = vmatprep.subr.bf16.mxu0 %v4214_v16 }
  0xa8   :  { %3620 = vmatprep.mubr.bf16.mxu1 %v3951_v53  ;;  %3907 = vset.pattern.permute.xlu0 %v4065_v52 }
  0xa9   :  { %3908 = vset.pattern.permute.xlu1 %v4065_v52  ;;  %2624 = vperm.xlu0 %3907, %v2614_v48   ;;  %v2621_v48 = vld [vmem:[%s4862_s4 + $0x38] sm:$0xff]  ;;  %v2686_v52 = vld [vmem:[%s4864_s6] sm:$0xff] }
  0xaa   :  { %3611 = vmatpush3.bf16.msra.mxu1 %v4180_v9  ;;  %3591 = vmatpush3.bf16.msra.mxu0 %v4214_v16 }
  0xab   :  { %3612 = vmatprep.subr.bf16.mxu1 %v4197_v13  ;;  %3592 = vmatprep.subr.bf16.mxu0 %v4231_v19 }
  0xad   :  { %2629 = vperm.xlu0 %3907, %v2615_v15  }
  0xae   :  { %3613 = vmatpush3.bf16.msra.mxu1 %v4197_v13  ;;  %3593 = vmatpush3.bf16.msra.mxu0 %v4231_v19 }
  0xaf   :  { %3614 = vmatprep.subr.bf16.mxu1 %v4214_v16  ;;  %3594 = vmatprep.subr.bf16.mxu0 %v4242_v21 }
  0xb2   :  { %3615 = vmatpush3.bf16.msra.mxu1 %v4214_v16  ;;  %3595 = vmatpush3.bf16.msra.mxu0 %v4242_v21 }
  0xb3   :  { %3616 = vmatprep.subr.bf16.mxu1 %v4231_v19  ;;  %3628 = vmatprep.subr.bf16.mxu0 %v4144_v0 }
  0xb5   :  { %3597 = vmatmul.mubr.bf16.vlgmr.msra.gmra.mrb[32].mxu0 %v3950_v54 }
  0xb6   :  { %3617 = vmatpush3.bf16.msra.mxu1 %v4231_v19  ;;  %3629 = vmatpush3.bf16.msra.mxu0 %v4144_v0 }
  0xb7   :  { %3618 = vmatprep.subr.bf16.mxu1 %v4242_v21  ;;  %3630 = vmatprep.subr.bf16.mxu0 %v4156_v4 }
  0xb8   :  { %3600 = vmatprep.mubr.bf16.mxu0 %v3953_v55 }
  0xba   :  { %3619 = vmatpush3.bf16.msra.mxu1 %v4242_v21  ;;  %3631 = vmatpush3.bf16.msra.mxu0 %v4156_v4 }
  0xbb   :  { %3652 = vmatprep.subr.bf16.mxu1 %v4144_v0  ;;  %3632 = vmatprep.subr.bf16.mxu0 %v4169_v7 }
  0xbd   :  { %3621 = vmatmul.mubr.bf16.vlgmr.msra.gmra.mrb[40].mxu1 %v3952_v56  ;;  %3601 = vmatmul.mubr.bf16.gmra.mrb[36].mxu0 %v3954_v57  ;;  %v3974_v57 = vld [vmem:[#allocation2 + $0x1c8] sm:$0xff]  }
  0xbe   :  { %3653 = vmatpush3.bf16.msra.mxu1 %v4144_v0  ;;  %3633 = vmatpush3.bf16.msra.mxu0 %v4169_v7 }
  0xbf   :  { %3654 = vmatprep.subr.bf16.mxu1 %v4156_v4  ;;  %3634 = vmatprep.subr.bf16.mxu0 %v4180_v9 }
  0xc0   :  { %3624 = vmatprep.mubr.bf16.mxu1 %v3955_v58  ;;  %3644 = vmatprep.mubr.bf16.mxu0 %v3957_v59 }
  0xc2   :  { %3655 = vmatpush3.bf16.msra.mxu1 %v4156_v4  ;;  %3635 = vmatpush3.bf16.msra.mxu0 %v4180_v9 }
  0xc3   :  { %3656 = vmatprep.subr.bf16.mxu1 %v4169_v7  ;;  %3636 = vmatprep.subr.bf16.mxu0 %v4197_v13 }
  0xc5   :  { %3625 = vmatmul.mubr.bf16.gmra.mrb[44].mxu1 %v3956_v60 }
  0xc6   :  { %3657 = vmatpush3.bf16.msra.mxu1 %v4169_v7  ;;  %3637 = vmatpush3.bf16.msra.mxu0 %v4197_v13 }
  0xc7   :  { %3658 = vmatprep.subr.bf16.mxu1 %v4180_v9  ;;  %3638 = vmatprep.subr.bf16.mxu0 %v4214_v16 }
  0xc8   :  { %3668 = vmatprep.mubr.bf16.mxu1 %v3959_v61 }
  0xca   :  { %3659 = vmatpush3.bf16.msra.mxu1 %v4180_v9  ;;  %3639 = vmatpush3.bf16.msra.mxu0 %v4214_v16 }
  0xcb   :  { %3660 = vmatprep.subr.bf16.mxu1 %v4197_v13  ;;  %3640 = vmatprep.subr.bf16.mxu0 %v4231_v19 }
  0xce   :  { %3661 = vmatpush3.bf16.msra.mxu1 %v4197_v13  ;;  %3641 = vmatpush3.bf16.msra.mxu0 %v4231_v19 }
  0xcf   :  { %3662 = vmatprep.subr.bf16.mxu1 %v4214_v16  ;;  %3642 = vmatprep.subr.bf16.mxu0 %v4242_v21 }
  0xd2   :  { %3663 = vmatpush3.bf16.msra.mxu1 %v4214_v16  ;;  %3643 = vmatpush3.bf16.msra.mxu0 %v4242_v21 }
  0xd3   :  { %3664 = vmatprep.subr.bf16.mxu1 %v4231_v19  ;;  %3676 = vmatprep.subr.bf16.mxu0 %v4144_v0 }
  0xd5   :  { %3645 = vmatmul.mubr.bf16.vlgmr.msra.gmra.mrb[40].mxu0 %v3958_v62 }
  0xd6   :  { %3665 = vmatpush3.bf16.msra.mxu1 %v4231_v19  ;;  %3677 = vmatpush3.bf16.msra.mxu0 %v4144_v0 }
  0xd7   :  { %3666 = vmatprep.subr.bf16.mxu1 %v4242_v21  ;;  %3678 = vmatprep.subr.bf16.mxu0 %v4156_v4 }
  0xd8   :  { %3648 = vmatprep.mubr.bf16.mxu0 %v3961_v63 }
  0xda   :  { %3667 = vmatpush3.bf16.msra.mxu1 %v4242_v21  ;;  %3679 = vmatpush3.bf16.msra.mxu0 %v4156_v4 }
  0xdb   :  { %3700 = vmatprep.subr.bf16.mxu1 %v4144_v0  ;;  %3680 = vmatprep.subr.bf16.mxu0 %v4169_v7  ;;  %v3964_v0 = vld [vmem:[#allocation2 + $0x178] sm:$0xff]  }
  0xdd   :  { %3669 = vmatmul.mubr.bf16.vlgmr.msra.gmra.mrb[48].mxu1 %v3960_v1  ;;  %3649 = vmatmul.mubr.bf16.gmra.mrb[44].mxu0 %v3962_v2 }
  0xde   :  { %3701 = vmatpush3.bf16.msra.mxu1 %v4423_v6  ;;  %3681 = vmatpush3.bf16.msra.mxu0 %v4169_v7 }
  0xdf   :  { %3702 = vmatprep.subr.bf16.mxu1 %v4156_v4  ;;  %3682 = vmatprep.subr.bf16.mxu0 %v4180_v9 }
  0xe0   :  { %3672 = vmatprep.mubr.bf16.mxu1 %v3963_v3  ;;  %3692 = vmatprep.mubr.bf16.mxu0 %v3965_v5 }
  0xe2   :  { %3703 = vmatpush3.bf16.msra.mxu1 %v4432_v8  ;;  %3683 = vmatpush3.bf16.msra.mxu0 %v4180_v9 }
  0xe3   :  { %3704 = vmatprep.subr.bf16.mxu1 %v4169_v7  ;;  %3684 = vmatprep.subr.bf16.mxu0 %v4197_v13 }
  0xe5   :  { %3673 = vmatmul.mubr.bf16.gmra.mrb[52].mxu1 %v3964_v0  ;;  %v2616_v0 = vld [vmem:[%s4862_s4 + $0x10] sm:$0xff] }
  0xe6   :  { %3705 = vmatpush3.bf16.msra.mxu1 %v4169_v7  ;;  %3685 = vmatpush3.bf16.msra.mxu0 %v4197_v13 }
  0xe7   :  { %3706 = vmatprep.subr.bf16.mxu1 %v4180_v9  ;;  %3686 = vmatprep.subr.bf16.mxu0 %v4214_v16 }
  0xe8   :  { %3716 = vmatprep.mubr.bf16.mxu1 %v3967_v10  ;;  %2634 = vperm.xlu1 %3908, %v2616_v0  }
  0xea   :  { %3707 = vmatpush3.bf16.msra.mxu1 %v4180_v9  ;;  %3687 = vmatpush3.bf16.msra.mxu0 %v4214_v16  ;;  %v3969_v9 = vld [vmem:[#allocation2 + $0x190] sm:$0xff]  }
  0xeb   :  { %3708 = vmatprep.subr.bf16.mxu1 %v4197_v13  ;;  %3688 = vmatprep.subr.bf16.mxu0 %v4231_v19 }
  0xee   :  { %3709 = vmatpush3.bf16.msra.mxu1 %v4197_v13  ;;  %3689 = vmatpush3.bf16.msra.mxu0 %v4231_v19 }
  0xef   :  { %3710 = vmatprep.subr.bf16.mxu1 %v4214_v16  ;;  %3690 = vmatprep.subr.bf16.mxu0 %v4242_v21 }
  0xf0   :  { %v4450_v4 = vpop.f32.mrb[0].mxu1 }
  0xf1   :  { %v4452_v7 = vpop.f32.mrb[1].mxu1 }
  0xf2   :  { %3711 = vmatpush3.bf16.msra.mxu1 %v4214_v16  ;;  %3691 = vmatpush3.bf16.msra.mxu0 %v4242_v21  ;;  %v3968_v16 = vld [vmem:[#allocation2 + $0x1a8] sm:$0xff]  }
  0xf3   :  { %3712 = vmatprep.subr.bf16.mxu1 %v4231_v19  ;;  %3724 = vmatprep.subr.bf16.mxu0 %v4423_v6 }
  0xf4   :  { %v4458_v12 = vpop.f32.mrb[2].mxu1 }
  0xf5   :  { %3693 = vmatmul.mubr.bf16.vlgmr.msra.gmra.mrb[48].mxu0 %v3966_v11  ;;  %v343_v13 = vpop.f32.mrb[3].mxu1 }
  0xf6   :  { %3713 = vmatpush3.bf16.msra.mxu1 %v4231_v19  ;;  %3725 = vmatpush3.bf16.msra.mxu0 %v4423_v6  ;;  %v4474_v19 = vld [vmem:[%s4858_s0 + $0x10] sm:$0xff]  }
  0xf7   :  { %3714 = vmatprep.subr.bf16.mxu1 %v4242_v21  ;;  %3726 = vmatprep.subr.bf16.mxu0 %v4432_v8 }
  0xf8   :  { %3696 = vmatprep.mubr.bf16.mxu0 %v3969_v9  ;;  %v4464_v14 = vpop.f32.mrb[4].mxu1  ;;  %v3977_v9 = vld [vmem:[#allocation2 + $0x1d0] sm:$0xff]  }
  0xf9   :  { %v4466_v18 = vpop.f32.mrb[5].mxu1 }
  0xfa   :  { %3715 = vmatpush3.bf16.msra.mxu1 %v4242_v21  ;;  %3727 = vmatpush3.bf16.msra.mxu0 %v4432_v8 }
  0xfb   :  { %3748 = vmatprep.subr.bf16.mxu1 %v4423_v6  ;;  %3728 = vmatprep.subr.bf16.mxu0 %v4474_v19 }
  0xfc   :  { %v4477_v22 = vpop.f32.mrb[6].mxu1 }
  0xfd   :  { %3717 = vmatmul.mubr.bf16.vlgmr.msra.gmra.mrb[56].mxu1 %v3968_v16  ;;  %3697 = vmatmul.mubr.bf16.gmra.mrb[52].mxu0 %v3970_v17  ;;  %v4481_v21 = vpop.f32.mrb[7].mxu1 }
  0xfe   :  { %3749 = vmatpush3.bf16.msra.mxu1 %v4423_v6  ;;  %3729 = vmatpush3.bf16.msra.mxu0 %v4474_v19 }
  0xff   :  { %3750 = vmatprep.subr.bf16.mxu1 %v4432_v8  ;;  %3730 = vmatprep.subr.bf16.mxu0 %v4489_v25 }
 0x100   :  { %3720 = vmatprep.mubr.bf16.mxu1 %v3971_v20  ;;  %3740 = vmatprep.mubr.bf16.mxu0 %v3973_v23 }
 0x102   :  { %3751 = vmatpush3.bf16.msra.mxu1 %v4432_v8  ;;  %3731 = vmatpush3.bf16.msra.mxu0 %v4489_v25 }
 0x103   :  { %3752 = vmatprep.subr.bf16.mxu1 %v4474_v19  ;;  %3732 = vmatprep.subr.bf16.mxu0 %v4501_v28 }
 0x105   :  { %3721 = vmatmul.mubr.bf16.gmra.mrb[60].mxu1 %v3972_v27  ;;  %v2618_v27 = vld [vmem:[%s4862_s4 + $0x20] sm:$0xff] }
 0x106   :  { %3753 = vmatpush3.bf16.msra.mxu1 %v4474_v19  ;;  %3733 = vmatpush3.bf16.msra.mxu0 %v4501_v28 }
 0x107   :  { %3754 = vmatprep.subr.bf16.mxu1 %v4489_v25  ;;  %3734 = vmatprep.subr.bf16.mxu0 %v4517_v32 }
 0x108   :  { %v3388_v33 = vpop.f32.mrb[0].mxu0  ;;  %3764 = vmatprep.mubr.bf16.mxu1 %v3975_v29  ;;  %2644 = vperm.xlu0 %3907, %v2618_v27  }
 0x109   :  { %v232_v35 = vmul.f32 %v3388_v33, %v229_v31  ;;  %v195_v36 = vpop.f32.mrb[1].mxu0 }
 0x10a   :  { %3755 = vmatpush3.bf16.msra.mxu1 %v4489_v25  ;;  %v230_v37 = vmul.f32 %v229_v31, %v195_v36  ;;  %v3389_v38 = vpop.f32.mrb[2].mxu0  ;;  %3735 = vmatpush3.bf16.msra.mxu0 %v4517_v32 }
 0x10b   :  { %v344_v39 = vadd.f32 %v343_v13, %v232_v35  ;;  %v233_v40 = vmul.f32 %v3389_v38, %v229_v31  ;;  %v198_v41 = vpop.f32.mrb[3].mxu0  ;;  %3756 = vmatprep.subr.bf16.mxu1 %v4501_v28  ;;  %3736 = vmatprep.subr.bf16.mxu0 %v4529_v42 }
 0x10c   :  { %v334_v43 = vadd.f32 %v4452_v7, %v230_v37  ;;  %v231_v44 = vmul.f32 %v229_v31, %v198_v41 }
 0x10d   :  { %v349_v46 = vadd.f32 %v4458_v12, %v233_v40  ;;  %v3981_v40 = vld [vmem:[#allocation2 + $0x200] sm:$0xff]  }
 0x10e   :  { %v339_v47 = vadd.f32 %v4450_v4, %v231_v44  ;;  %3757 = vmatpush3.bf16.msra.mxu1 %v4501_v28  ;;  %3737 = vmatpush3.bf16.msra.mxu0 %v4529_v42  ;;  %v2619_v44 = vld [vmem:[%s4862_s4 + $0x28] sm:$0xff] }
 0x10f   :  { %3758 = vmatprep.subr.bf16.mxu1 %v4517_v32  ;;  %3738 = vmatprep.subr.bf16.mxu0 %v4548_v49 }
 0x110   :  { %v3430_v50 = vpop.f32.mrb[8].mxu1  ;;  %v3392_v51 = vpop.f32.mrb[4].mxu0 }
 0x111   :  { %v476_v53 = vmul.f32 %v3430_v50, %v4535_v45  ;;  %v439_v54 = vpop.f32.mrb[9].mxu1  ;;  %v236_v55 = vmul.f32 %v3392_v51, %v229_v31  ;;  %v211_v56 = vpop.f32.mrb[5].mxu0  ;;  %v3983_v50 = vld [vmem:[#allocation2 + $0x220] sm:$0xff]  }
 0x112   :  { %v474_v58 = vmul.f32 %v4535_v45, %v439_v54  ;;  %v3431_v59 = vpop.f32.mrb[10].mxu1  ;;  %3759 = vmatpush3.bf16.msra.mxu1 %v4517_v32  ;;  %v234_v60 = vmul.f32 %v229_v31, %v211_v56  ;;  %v3393_v61 = vpop.f32.mrb[6].mxu0  ;;  %3739 = vmatpush3.bf16.msra.mxu0 %v4548_v49 }
 0x113   :  { %v4555_v62 = vadd.f32 %v476_v53, %v344_v39  ;;  %v364_v63 = vadd.f32 %v4481_v21, %v236_v55  ;;  %v477_v1 = vmul.f32 %v3431_v59, %v4535_v45  ;;  %v442_v2 = vpop.f32.mrb[11].mxu1  ;;  %v237_v3 = vmul.f32 %v3393_v61, %v229_v31  ;;  %v214_v5 = vpop.f32.mrb[7].mxu0  ;;  %3760 = vmatprep.subr.bf16.mxu1 %v4529_v42  ;;  %v3976_v21 = vld [vmem:[#allocation2 + $0x1e8] sm:$0xff]   ;;  %v3979_v39 = vld [vmem:[#allocation2 + $0x1f0] sm:$0xff]   ;;  %v2689_v61 = vld [vmem:[%s4864_s6 + $0x18] sm:$0xff] }
 0x114   :  { %v4563_v10 = vadd.f32 %v474_v58, %v334_v43  ;;  %v354_v4 = vadd.f32 %v4466_v18, %v234_v60  ;;  %v475_v7 = vmul.f32 %v4535_v45, %v442_v2  ;;  %v235_v11 = vmul.f32 %v229_v31, %v214_v5  ;;  %3772 = vmatprep.subr.bf16.mxu0 %v4423_v6  ;;  %v2617_v18 = vld [vmem:[%s4862_s4 + $0x18] sm:$0xff]  ;;  %v2687_v53 = vld [vmem:[%s4864_s6 + $0x8] sm:$0xff]  ;;  %v2688_v58 = vld [vmem:[%s4864_s6 + $0x10] sm:$0xff] }
 0x115   :  { %v4568_v12 = vadd.f32 %v477_v1, %v349_v46  ;;  %v369_v13 = vadd.f32 %v4477_v22, %v237_v3  ;;  %3741 = vmatmul.mubr.bf16.vlgmr.msra.gmra.mrb[56].mxu0 %v3974_v57  ;;  %2639 = vperm.xlu1 %3908, %v2617_v18   ;;  %v4614_v46 = vsub.s32 2, %v4479_v24  ;;  %v4638_v55 = vsub.s32 3, %v4479_v24 }
 0x116   :  { %v4574_v16 = vadd.f32 %v475_v7, %v339_v47  ;;  %v359_v17 = vadd.f32 %v4464_v14, %v235_v11  ;;  %3761 = vmatpush3.bf16.msra.mxu1 %v4529_v42  ;;  %3773 = vmatpush3.bf16.msra.mxu0 %v4423_v6  ;;  %v3978_v14 = vld [vmem:[#allocation2 + $0x1d8] sm:$0xff]  }
 0x117   :  { %3762 = vmatprep.subr.bf16.mxu1 %v4548_v49  ;;  %3774 = vmatprep.subr.bf16.mxu0 %v4432_v8  ;;  %v3980_v47 = vld [vmem:[#allocation2 + $0x1f8] sm:$0xff]   ;;  %v4625_v51 = vrot.slane %v4507_v30, %v4614_v46  ;;  %v4658_v0 = vrot.slane %v4507_v30, %v4638_v55 }
 0x118   :  { %v3434_v20 = vpop.f32.mrb[12].mxu1  ;;  %3744 = vmatprep.mubr.bf16.mxu0 %v3977_v9 }
 0x119   :  { %v480_v22 = vmul.f32 %v3434_v20, %v4535_v45  ;;  %v455_v23 = vpop.f32.mrb[13].mxu1  ;;  %2649 = vperm.xlu1 %3908, %v2619_v44  }
 0x11a   :  { %v478_v29 = vmul.f32 %v4535_v45, %v455_v23  ;;  %v3435_v31 = vpop.f32.mrb[14].mxu1  ;;  %3763 = vmatpush3.bf16.msra.mxu1 %v4548_v49  ;;  %3775 = vmatpush3.bf16.msra.mxu0 %v4432_v8 }
 0x11b   :  { %v4591_v33 = vadd.f32 %v480_v22, %v364_v63  ;;  %v481_v35 = vmul.f32 %v3435_v31, %v4535_v45  ;;  %v458_v36 = vpop.f32.mrb[15].mxu1  ;;  %3796 = vmatprep.subr.bf16.mxu1 %v4423_v6  ;;  %3776 = vmatprep.subr.bf16.mxu0 %v4474_v19 }
 0x11c   :  { %v4596_v37 = vadd.f32 %v478_v29, %v354_v4  ;;  %v479_v38 = vmul.f32 %v4535_v45, %v458_v36  ;;  %v2620_v45 = vld [vmem:[%s4862_s4 + $0x30] sm:$0xff] }
 0x11d   :  { %v4599_v41 = vadd.f32 %v481_v35, %v369_v13  ;;  %3765 = vmatmul.mubr.bf16.vlgmr.msra.gmra.mrb[64].mxu1 %v3976_v21  ;;  %3745 = vmatmul.mubr.bf16.gmra.mrb[60].mxu0 %v3978_v14  ;;  %v2788_v21 = vld [vmem:[%s4866_s8 + $0x10] sm:$0xff] }
 0x11e   :  { %v4601_v43 = vadd.f32 %v479_v38, %v359_v17  ;;  %3797 = vmatpush3.bf16.msra.mxu1 %v4423_v6  ;;  %3777 = vmatpush3.bf16.msra.mxu0 %v4474_v19  ;;  %v3982_v17 = vld [vmem:[#allocation2 + $0x208] sm:$0xff]  }
 0x11f   :  { %3798 = vmatprep.subr.bf16.mxu1 %v4432_v8  ;;  %3778 = vmatprep.subr.bf16.mxu0 %v4489_v25 }
 0x120   :  { %3768 = vmatprep.mubr.bf16.mxu1 %v3979_v39  ;;  %3788 = vmatprep.mubr.bf16.mxu0 %v3981_v40 }
 0x121   :  { %2654 = vperm.xlu0 %3907, %v2620_v45   ;;  %2659 = vperm.xlu1 %3908, %v2621_v48   ;;  %v3985_v45 = vld [vmem:[#allocation2 + $0x210] sm:$0xff]   ;;  %v2789_v48 = vld [vmem:[%s4866_s8 + $0x18] sm:$0xff] }
 0x122   :  { %3799 = vmatpush3.bf16.msra.mxu1 %v4432_v8  ;;  %3779 = vmatpush3.bf16.msra.mxu0 %v4489_v25 }
 0x123   :  { %3800 = vmatprep.subr.bf16.mxu1 %v4474_v19  ;;  %3780 = vmatprep.subr.bf16.mxu0 %v4501_v28 }
 0x125   :  { %3769 = vmatmul.mubr.bf16.gmra.mrb[68].mxu1 %v3980_v47  ;;  %2692 = vperm.xlu0 %3907, %v2686_v52  }
 0x126   :  { %3801 = vmatpush3.bf16.msra.mxu1 %v4474_v19  ;;  %3781 = vmatpush3.bf16.msra.mxu0 %v4501_v28 }
 0x127   :  { %3802 = vmatprep.subr.bf16.mxu1 %v4489_v25  ;;  %3782 = vmatprep.subr.bf16.mxu0 %v4517_v32 }
 0x128   :  { %v3454_v54 = vpop.f32.mrb[8].mxu0  ;;  %3812 = vmatprep.mubr.bf16.mxu1 %v3983_v50  ;;  %2697 = vperm.xlu1 %3908, %v2687_v53  }
 0x129   :  { %v594_v56 = vmul.f32 %v3454_v54, %v4625_v51  ;;  %v557_v57 = vpop.f32.mrb[9].mxu0  ;;  %2702 = vperm.xlu0 %3907, %v2688_v58   ;;  %v3984_v54 = vld [vmem:[#allocation2 + $0x228] sm:$0xff]  }
 0x12a   :  { %3803 = vmatpush3.bf16.msra.mxu1 %v4489_v25  ;;  %v592_v59 = vmul.f32 %v4625_v51, %v557_v57  ;;  %v3455_v60 = vpop.f32.mrb[10].mxu0  ;;  %3783 = vmatpush3.bf16.msra.mxu0 %v4517_v32 }
 0x12b   :  { %v602_v63 = vadd.f32 %v594_v56, %v4555_v62  ;;  %v595_v1 = vmul.f32 %v3455_v60, %v4625_v51  ;;  %v560_v2 = vpop.f32.mrb[11].mxu0  ;;  %3804 = vmatprep.subr.bf16.mxu1 %v4501_v28  ;;  %3784 = vmatprep.subr.bf16.mxu0 %v4529_v42  ;;  %v2786_v62 = vld [vmem:[%s4866_s8] sm:$0xff]  ;;  %v2887_v56 = vld [vmem:[%s4868_s10 + $0x8] sm:$0xff] }
 0x12c   :  { %v600_v3 = vadd.f32 %v592_v59, %v4563_v10  ;;  %v593_v5 = vmul.f32 %v4625_v51, %v560_v2  ;;  %2707 = vperm.xlu1 %3908, %v2689_v61   ;;  %v2787_v10 = vld [vmem:[%s4866_s8 + $0x8] sm:$0xff]  ;;  %v3987_v2 = vld [vmem:[#allocation2 + $0x230] sm:$0xff]  }
 0x12d   :  { %v603_v4 = vadd.f32 %v595_v1, %v4568_v12  ;;  %2792 = vperm.xlu0 %3907, %v2786_v62   ;;  %v2888_v62 = vld [vmem:[%s4868_s10 + $0x10] sm:$0xff] }
 0x12e   :  { %v601_v7 = vadd.f32 %v593_v5, %v4574_v16  ;;  %3805 = vmatpush3.bf16.msra.mxu1 %v4501_v28  ;;  %3785 = vmatpush3.bf16.msra.mxu0 %v4529_v42 }
 0x12f   :  { %3806 = vmatprep.subr.bf16.mxu1 %v4517_v32  ;;  %3786 = vmatprep.subr.bf16.mxu0 %v4548_v49 }
 0x130   :  { %v3478_v11 = vpop.f32.mrb[16].mxu1  ;;  %v3458_v9 = vpop.f32.mrb[12].mxu0  ;;  %2797 = vperm.xlu1 %3908, %v2787_v10   ;;  %v826_v10 = vsub.s32 4, %v4479_v24 }
 0x131   :  { %v712_v12 = vmul.f32 %v3478_v11, %v4658_v0  ;;  %v675_v13 = vpop.f32.mrb[17].mxu1  ;;  %v598_v15 = vmul.f32 %v3458_v9, %v4625_v51  ;;  %v573_v16 = vpop.f32.mrb[13].mxu0  ;;  %2802 = vperm.xlu0 %3907, %v2788_v21  }
 0x132   :  { %v710_v18 = vmul.f32 %v4658_v0, %v675_v13  ;;  %v3479_v20 = vpop.f32.mrb[18].mxu1  ;;  %3807 = vmatpush3.bf16.msra.mxu1 %v4517_v32  ;;  %v596_v22 = vmul.f32 %v4625_v51, %v573_v16  ;;  %v3459_v23 = vpop.f32.mrb[14].mxu0  ;;  %3787 = vmatpush3.bf16.msra.mxu0 %v4548_v49  ;;  %v827_v11 = vrot.slane %v4507_v30, %v826_v10  ;;  %v944_v13 = vsub.s32 5, %v4479_v24 }
 0x133   :  { %v4681_v14 = vadd.f32 %v712_v12, %v602_v63  ;;  %v606_v27 = vadd.f32 %v598_v15, %v4591_v33  ;;  %v713_v29 = vmul.f32 %v3479_v20, %v4658_v0  ;;  %v678_v31 = vpop.f32.mrb[19].mxu1  ;;  %v599_v35 = vmul.f32 %v3459_v23, %v4625_v51  ;;  %v576_v36 = vpop.f32.mrb[15].mxu0  ;;  %3808 = vmatprep.subr.bf16.mxu1 %v4529_v42 }
 0x134   :  { %v4687_v38 = vadd.f32 %v710_v18, %v600_v3  ;;  %v604_v39 = vadd.f32 %v596_v22, %v4596_v37  ;;  %v711_v40 = vmul.f32 %v4658_v0, %v678_v31  ;;  %v597_v44 = vmul.f32 %v4625_v51, %v576_v36  ;;  %3820 = vmatprep.subr.bf16.mxu0 %v4423_v6  ;;  %v2886_v51 = vld [vmem:[%s4868_s10] sm:$0xff] }
 0x135   :  { %v4693_v33 = vadd.f32 %v713_v29, %v603_v4  ;;  %v607_v47 = vadd.f32 %v599_v35, %v4599_v41  ;;  %3789 = vmatmul.mubr.bf16.vlgmr.msra.gmra.mrb[64].mxu0 %v3982_v17  ;;  %2807 = vperm.xlu1 %3908, %v2789_v48   ;;  %v3989_v3 = vld [vmem:[#allocation2 + $0x240] sm:$0xff]  }
 0x136   :  { %v4699_v50 = vadd.f32 %v711_v40, %v601_v7  ;;  %v605_v37 = vadd.f32 %v597_v44, %v4601_v43  ;;  %3809 = vmatpush3.bf16.msra.mxu1 %v4529_v42  ;;  %3821 = vmatpush3.bf16.msra.mxu0 %v4423_v6  ;;  %v3986_v43 = vld [vmem:[#allocation2 + $0x218] sm:$0xff]  }
 0x137   :  { %3810 = vmatprep.subr.bf16.mxu1 %v4548_v49  ;;  %3822 = vmatprep.subr.bf16.mxu0 %v4432_v8  ;;  %v3988_v7 = vld [vmem:[#allocation2 + $0x238] sm:$0xff]  }
 0x138   :  { %v3482_v41 = vpop.f32.mrb[20].mxu1  ;;  %3792 = vmatprep.mubr.bf16.mxu0 %v3985_v45  ;;  %2892 = vperm.xlu0 %3907, %v2886_v51  }
 0x139   :  { %v716_v52 = vmul.f32 %v3482_v41, %v4658_v0  ;;  %v691_v53 = vpop.f32.mrb[21].mxu1  ;;  %2897 = vperm.xlu1 %3908, %v2887_v56  }
 0x13a   :  { %v714_v57 = vmul.f32 %v4658_v0, %v691_v53  ;;  %v3483_v58 = vpop.f32.mrb[22].mxu1  ;;  %3811 = vmatpush3.bf16.msra.mxu1 %v4548_v49  ;;  %3823 = vmatpush3.bf16.msra.mxu0 %v4432_v8 }
 0x13b   :  { %v4716_v59 = vadd.f32 %v716_v52, %v606_v27  ;;  %v717_v60 = vmul.f32 %v3483_v58, %v4658_v0  ;;  %v694_v61 = vpop.f32.mrb[23].mxu1  ;;  %3844 = vmatprep.subr.bf16.mxu1 %v4423_v6  ;;  %3824 = vmatprep.subr.bf16.mxu0 %v4474_v19 }
 0x13c   :  { %v4721_v63 = vadd.f32 %v714_v57, %v604_v39  ;;  %v715_v1 = vmul.f32 %v4658_v0, %v694_v61  ;;  %v2889_v0 = vld [vmem:[%s4868_s10 + $0x18] sm:$0xff]  ;;  %2902 = vperm.xlu0 %3907, %v2888_v62   ;;  %v3992_v61 = vld [vmem:[#allocation2 + $0x268] sm:$0xff]  }
 0x13d   :  { %v4724_v5 = vadd.f32 %v717_v60, %v607_v47  ;;  %3813 = vmatmul.mubr.bf16.vlgmr.msra.gmra.mrb[72].mxu1 %v3984_v54  ;;  %3793 = vmatmul.mubr.bf16.gmra.mrb[68].mxu0 %v3986_v43 }
 0x13e   :  { %v4726_v4 = vadd.f32 %v715_v1, %v605_v37  ;;  %3845 = vmatpush3.bf16.msra.mxu1 %v4423_v6  ;;  %3825 = vmatpush3.bf16.msra.mxu0 %v4474_v19  ;;  %v3991_v6 = vld [vmem:[#allocation2 + $0x260] sm:$0xff]   ;;  %v3994_v1 = vld [vmem:[#allocation2 + $0x258] sm:$0xff]  }
 0x13f   :  { %3846 = vmatprep.subr.bf16.mxu1 %v4432_v8  ;;  %3826 = vmatprep.subr.bf16.mxu0 %v4489_v25 }
 0x140   :  { %3816 = vmatprep.mubr.bf16.mxu1 %v3987_v2  ;;  %3836 = vmatprep.mubr.bf16.mxu0 %v3989_v3  ;;  %v3995_v3 = vld [vmem:[#allocation2 + $0x270] sm:$0xff]  }
 0x141   :  { %2907 = vperm.xlu1 %3908, %v2889_v0  }
 0x142   :  { %3847 = vmatpush3.bf16.msra.mxu1 %v4432_v8  ;;  %3827 = vmatpush3.bf16.msra.mxu0 %v4489_v25 }
 0x143   :  { %3848 = vmatprep.subr.bf16.mxu1 %v4474_v19  ;;  %3828 = vmatprep.subr.bf16.mxu0 %v4501_v28 }
 0x145   :  { %3817 = vmatmul.mubr.bf16.gmra.mrb[76].mxu1 %v3988_v7 }
 0x146   :  { %3849 = vmatpush3.bf16.msra.mxu1 %v4474_v19  ;;  %3829 = vmatpush3.bf16.msra.mxu0 %v4501_v28 }
 0x147   :  { %3850 = vmatprep.subr.bf16.mxu1 %v4489_v25  ;;  %3830 = vmatprep.subr.bf16.mxu0 %v4517_v32 }
 0x148   :  { %v3502_v8 = vpop.f32.mrb[16].mxu0  ;;  %3860 = vmatprep.mubr.bf16.mxu1 %v3991_v6 }
 0x149   :  { %v830_v9 = vmul.f32 %v3502_v8, %v827_v11  ;;  %v793_v12 = vpop.f32.mrb[17].mxu0  ;;  %v1062_v8 = vsub.s32 6, %v4479_v24 }
 0x14a   :  { %3851 = vmatpush3.bf16.msra.mxu1 %v4489_v25  ;;  %v828_v15 = vmul.f32 %v827_v11, %v793_v12  ;;  %v3503_v16 = vpop.f32.mrb[18].mxu0  ;;  %3831 = vmatpush3.bf16.msra.mxu0 %v4517_v32  ;;  %v945_v25 = vrot.slane %v4507_v30, %v944_v13 }
 0x14b   :  { %v838_v19 = vadd.f32 %v830_v9, %v4681_v14  ;;  %v831_v17 = vmul.f32 %v3503_v16, %v827_v11  ;;  %v796_v18 = vpop.f32.mrb[19].mxu0  ;;  %3852 = vmatprep.subr.bf16.mxu1 %v4501_v28  ;;  %3832 = vmatprep.subr.bf16.mxu0 %v4529_v42  ;;  %v1063_v9 = vrot.slane %v4507_v30, %v1062_v8  ;;  %v1180_v16 = vsub.s32 7, %v4479_v24 }
 0x14c   :  { %v836_v20 = vadd.f32 %v828_v15, %v4687_v38  ;;  %v829_v22 = vmul.f32 %v827_v11, %v796_v18  ;;  %v3990_v38 = vld [vmem:[#allocation2 + $0x248] sm:$0xff]  }
 0x14d   :  { %v839_v23 = vadd.f32 %v831_v17, %v4693_v33 }
 0x14e   :  { %v837_v21 = vadd.f32 %v829_v22, %v4699_v50  ;;  %3853 = vmatpush3.bf16.msra.mxu1 %v4501_v28  ;;  %3833 = vmatpush3.bf16.msra.mxu0 %v4529_v42  ;;  %v3993_v28 = vld [vmem:[#allocation2 + $0x250] sm:$0xff]  }
 0x14f   :  { %3854 = vmatprep.subr.bf16.mxu1 %v4517_v32  ;;  %3834 = vmatprep.subr.bf16.mxu0 %v4548_v49 }
 0x150   :  { %v3526_v14 = vpop.f32.mrb[24].mxu1  ;;  %v3506_v27 = vpop.f32.mrb[20].mxu0 }
 0x151   :  { %v948_v29 = vmul.f32 %v3526_v14, %v945_v25  ;;  %v911_v31 = vpop.f32.mrb[25].mxu1  ;;  %v834_v35 = vmul.f32 %v3506_v27, %v827_v11  ;;  %v809_v36 = vpop.f32.mrb[21].mxu0  ;;  %v1181_v14 = vrot.slane %v4507_v30, %v1180_v16 }
 0x152   :  { %v946_v39 = vmul.f32 %v945_v25, %v911_v31  ;;  %v3527_v40 = vpop.f32.mrb[26].mxu1  ;;  %3855 = vmatpush3.bf16.msra.mxu1 %v4517_v32  ;;  %v832_v44 = vmul.f32 %v827_v11, %v809_v36  ;;  %v3507_v45 = vpop.f32.mrb[22].mxu0  ;;  %3835 = vmatpush3.bf16.msra.mxu0 %v4548_v49 }
 0x153   :  { %v956_v33 = vadd.f32 %v948_v29, %v838_v19  ;;  %v842_v47 = vadd.f32 %v834_v35, %v4716_v59  ;;  %v949_v48 = vmul.f32 %v3527_v40, %v945_v25  ;;  %v914_v50 = vpop.f32.mrb[27].mxu1  ;;  %v835_v37 = vmul.f32 %v3507_v45, %v827_v11  ;;  %v812_v51 = vpop.f32.mrb[23].mxu0  ;;  %3856 = vmatprep.subr.bf16.mxu1 %v4529_v42 }
 0x154   :  { %v954_v41 = vadd.f32 %v946_v39, %v836_v20  ;;  %v840_v52 = vadd.f32 %v832_v44, %v4721_v63  ;;  %v947_v53 = vmul.f32 %v945_v25, %v914_v50  ;;  %v833_v54 = vmul.f32 %v827_v11, %v812_v51  ;;  %v3996_v11 = vld [vmem:[#allocation2 + $0x278] sm:$0xff]  }
 0x155   :  { %v957_v32 = vadd.f32 %v949_v48, %v839_v23  ;;  %v843_v43 = vadd.f32 %v835_v37, %v4724_v5  ;;  %3837 = vmatmul.mubr.bf16.vlgmr.msra.gmra.mrb[72].mxu0 %v3990_v38 }
 0x156   :  { %v955_v56 = vadd.f32 %v947_v53, %v837_v21  ;;  %v841_v57 = vadd.f32 %v833_v54, %v4726_v4  ;;  %3857 = vmatpush3.bf16.msra.mxu1 %v4529_v42  ;;  %3840 = vmatprep.mubr.bf16.mxu0 %v3993_v28 }
 0x157   :  { %3858 = vmatprep.subr.bf16.mxu1 %v4548_v49 }
 0x158   :  { %v3530_v58 = vpop.f32.mrb[28].mxu1 }
 0x159   :  { %v952_v59 = vmul.f32 %v3530_v58, %v945_v25  ;;  %v927_v60 = vpop.f32.mrb[29].mxu1 }
 0x15a   :  { %v950_v63 = vmul.f32 %v945_v25, %v927_v60  ;;  %v3531_v2 = vpop.f32.mrb[30].mxu1  ;;  %3859 = vmatpush3.bf16.msra.mxu1 %v4548_v49 }
 0x15b   :  { %v960_v5 = vadd.f32 %v952_v59, %v842_v47  ;;  %v953_v62 = vmul.f32 %v3531_v2, %v945_v25  ;;  %v930_v0 = vpop.f32.mrb[31].mxu1 }
 0x15c   :  { %v958_v7 = vadd.f32 %v950_v63, %v840_v52  ;;  %v951_v4 = vmul.f32 %v945_v25, %v930_v0 }
 0x15d   :  { %v961_v6 = vadd.f32 %v953_v62, %v843_v43  ;;  %3861 = vmatmul.mubr.bf16.vlgmr.msra.gmra.mrb[80].mxu1 %v3992_v61  ;;  %3841 = vmatmul.mubr.bf16.gmra.mrb[76].mxu0 %v3994_v1 }
 0x15e   :  { %v959_v42 = vadd.f32 %v951_v4, %v841_v57  ;;  %3864 = vmatprep.mubr.bf16.mxu1 %v3995_v3 }
 0x165   :  { %3865 = vmatmul.mubr.bf16.gmra.mrb[84].mxu1 %v3996_v11 }
 0x168   :  { %v3550_v49 = vpop.f32.mrb[24].mxu0 }
 0x169   :  { %v1066_v12 = vmul.f32 %v3550_v49, %v1063_v9  ;;  %v1029_v15 = vpop.f32.mrb[25].mxu0 }
 0x16a   :  { %v1064_v19 = vmul.f32 %v1063_v9, %v1029_v15  ;;  %v3551_v17 = vpop.f32.mrb[26].mxu0 }
 0x16b   :  { %v1074_v18 = vadd.f32 %v1066_v12, %v956_v33  ;;  %v1067_v20 = vmul.f32 %v3551_v17, %v1063_v9  ;;  %v1032_v22 = vpop.f32.mrb[27].mxu0 }
 0x16c   :  { %v1072_v23 = vadd.f32 %v1064_v19, %v954_v41  ;;  %v1065_v25 = vmul.f32 %v1063_v9, %v1032_v22 }
 0x16d   :  { %v1075_v21 = vadd.f32 %v1067_v20, %v957_v32 }
 0x16e   :  { %v1073_v27 = vadd.f32 %v1065_v25, %v955_v56 }
 0x170   :  { %v3574_v29 = vpop.f32.mrb[32].mxu1  ;;  %v3554_v31 = vpop.f32.mrb[28].mxu0 }
 0x171   :  { %v1184_v35 = vmul.f32 %v3574_v29, %v1181_v14  ;;  %v1147_v36 = vpop.f32.mrb[33].mxu1  ;;  %v1070_v38 = vmul.f32 %v3554_v31, %v1063_v9  ;;  %v1045_v39 = vpop.f32.mrb[29].mxu0 }
 0x172   :  { %v1182_v40 = vmul.f32 %v1181_v14, %v1147_v36  ;;  %v3575_v44 = vpop.f32.mrb[34].mxu1  ;;  %v1068_v45 = vmul.f32 %v1063_v9, %v1045_v39  ;;  %v3555_v28 = vpop.f32.mrb[30].mxu0 }
 0x173   :  { %v1192_v33 = vadd.f32 %v1184_v35, %v1074_v18  ;;  %v1078_v47 = vadd.f32 %v1070_v38, %v960_v5  ;;  %v1185_v48 = vmul.f32 %v3575_v44, %v1181_v14  ;;  %v1150_v50 = vpop.f32.mrb[35].mxu1  ;;  %v1071_v37 = vmul.f32 %v3555_v28, %v1063_v9  ;;  %v1048_v51 = vpop.f32.mrb[31].mxu0 }
 0x174   :  { %v1190_v41 = vadd.f32 %v1182_v40, %v1072_v23  ;;  %v1076_v52 = vadd.f32 %v1068_v45, %v958_v7  ;;  %v1183_v30 = vmul.f32 %v1181_v14, %v1150_v50  ;;  %v1069_v53 = vmul.f32 %v1063_v9, %v1048_v51  ;;  %v4787_v7 = vld [vmem:[%s4859_s1 + $0x8] sm:$0xff] }
 0x175   :  { %v1193_v54 = vadd.f32 %v1185_v48, %v1075_v21  ;;  %v1079_v32 = vadd.f32 %v1071_v37, %v961_v6  ;;  %v1299_v4 = vrot.slane %v4787_v7, %v4493_v26  ;;  %v1417_v20 = vrot.slane %v4787_v7, %v4521_v34 }
 0x176   :  { %v1191_v43 = vadd.f32 %v1183_v30, %v1073_v27  ;;  %v1077_v56 = vadd.f32 %v1069_v53, %v959_v42 }
 0x178   :  { %v3578_v57 = vpop.f32.mrb[36].mxu1 }
 0x179   :  { %v1188_v58 = vmul.f32 %v3578_v57, %v1181_v14  ;;  %v1163_v59 = vpop.f32.mrb[37].mxu1 }
 0x17a   :  { %v1186_v60 = vmul.f32 %v1181_v14, %v1163_v59  ;;  %v3579_v61 = vpop.f32.mrb[38].mxu1 }
 0x17b   :  { %v1196_v1 = vadd.f32 %v1188_v58, %v1078_v47  ;;  %v1189_v63 = vmul.f32 %v3579_v61, %v1181_v14  ;;  %v1166_v2 = vpop.f32.mrb[39].mxu1 }
 0x17c   :  { %v1194_v3 = vadd.f32 %v1186_v60, %v1076_v52  ;;  %v1187_v5 = vmul.f32 %v1181_v14, %v1166_v2 }
 0x17d   :  { %v1197_v62 = vadd.f32 %v1189_v63, %v1079_v32 }
 0x17e   :  { %v1195_v0 = vadd.f32 %v1187_v5, %v1077_v56 }
 0x188   :  { %v3598_v6 = vpop.f32.mrb[32].mxu0 }
 0x189   :  { %v1302_v42 = vmul.f32 %v3598_v6, %v1299_v4  ;;  %v1265_v11 = vpop.f32.mrb[33].mxu0 }
 0x18a   :  { %v1300_v9 = vmul.f32 %v1299_v4, %v1265_v11  ;;  %v3599_v49 = vpop.f32.mrb[34].mxu0 }
 0x18b   :  { %v1310_v12 = vadd.f32 %v1302_v42, %v1192_v33  ;;  %v1303_v15 = vmul.f32 %v3599_v49, %v1299_v4  ;;  %v1268_v19 = vpop.f32.mrb[35].mxu0 }
 0x18c   :  { %v1308_v17 = vadd.f32 %v1300_v9, %v1190_v41  ;;  %v1301_v18 = vmul.f32 %v1299_v4, %v1268_v19 }
 0x18d   :  { %v1311_v22 = vadd.f32 %v1303_v15, %v1193_v54  ;;  %v1653_v15 = vrot.slane %v4787_v7, %v4638_v55 }
 0x18e   :  { %v1309_v23 = vadd.f32 %v1301_v18, %v1191_v43 }
 0x190   :  { %v3622_v25 = vpop.f32.mrb[40].mxu1  ;;  %v3602_v21 = vpop.f32.mrb[36].mxu0 }
 0x191   :  { %v1420_v14 = vmul.f32 %v3622_v25, %v1417_v20  ;;  %v1383_v27 = vpop.f32.mrb[41].mxu1  ;;  %v1306_v29 = vmul.f32 %v3602_v21, %v1299_v4  ;;  %v1281_v31 = vpop.f32.mrb[37].mxu0 }
 0x192   :  { %v1418_v35 = vmul.f32 %v1417_v20, %v1383_v27  ;;  %v3623_v36 = vpop.f32.mrb[42].mxu1  ;;  %v1304_v38 = vmul.f32 %v1299_v4, %v1281_v31  ;;  %v3603_v39 = vpop.f32.mrb[38].mxu0 }
 0x193   :  { %v1428_v40 = vadd.f32 %v1420_v14, %v1310_v12  ;;  %v1314_v44 = vadd.f32 %v1306_v29, %v1196_v1  ;;  %v1421_v45 = vmul.f32 %v3623_v36, %v1417_v20  ;;  %v1386_v28 = vpop.f32.mrb[43].mxu1  ;;  %v1307_v33 = vmul.f32 %v3603_v39, %v1299_v4  ;;  %v1284_v47 = vpop.f32.mrb[39].mxu0 }
 0x194   :  { %v1426_v48 = vadd.f32 %v1418_v35, %v1308_v17  ;;  %v1312_v50 = vadd.f32 %v1304_v38, %v1194_v3  ;;  %v1419_v37 = vmul.f32 %v1417_v20, %v1386_v28  ;;  %v1305_v51 = vmul.f32 %v1299_v4, %v1284_v47 }
 0x195   :  { %v1429_v41 = vadd.f32 %v1421_v45, %v1311_v22  ;;  %v1315_v52 = vadd.f32 %v1307_v33, %v1197_v62  ;;  %v1535_v3 = vrot.slane %v4787_v7, %v4614_v46 }
 0x196   :  { %v1427_v30 = vadd.f32 %v1419_v37, %v1309_v23  ;;  %v1313_v53 = vadd.f32 %v1305_v51, %v1195_v0 }
 0x198   :  { %v3626_v54 = vpop.f32.mrb[44].mxu1 }
 0x199   :  { %v1424_v32 = vmul.f32 %v3626_v54, %v1417_v20  ;;  %v1399_v43 = vpop.f32.mrb[45].mxu1 }
 0x19a   :  { %v1422_v56 = vmul.f32 %v1417_v20, %v1399_v43  ;;  %v3627_v57 = vpop.f32.mrb[46].mxu1 }
 0x19b   :  { %v1432_v58 = vadd.f32 %v1424_v32, %v1314_v44  ;;  %v1425_v59 = vmul.f32 %v3627_v57, %v1417_v20  ;;  %v1402_v60 = vpop.f32.mrb[47].mxu1 }
 0x19c   :  { %v1430_v61 = vadd.f32 %v1422_v56, %v1312_v50  ;;  %v1423_v1 = vmul.f32 %v1417_v20, %v1402_v60 }
 0x19d   :  { %v1433_v63 = vadd.f32 %v1425_v59, %v1315_v52 }
 0x19e   :  { %v1431_v2 = vadd.f32 %v1423_v1, %v1313_v53 }
 0x1a8   :  { %v3646_v5 = vpop.f32.mrb[40].mxu0 }
 0x1a9   :  { %v1538_v4 = vmul.f32 %v3646_v5, %v1535_v3  ;;  %v1501_v62 = vpop.f32.mrb[41].mxu0 }
 0x1aa   :  { %v1536_v6 = vmul.f32 %v1535_v3, %v1501_v62  ;;  %v3647_v0 = vpop.f32.mrb[42].mxu0 }
 0x1ab   :  { %v1546_v42 = vadd.f32 %v1538_v4, %v1428_v40  ;;  %v1539_v11 = vmul.f32 %v3647_v0, %v1535_v3  ;;  %v1504_v9 = vpop.f32.mrb[43].mxu0  ;;  %v3997_v0 = vld [vmem:[%s4863_s5] sm:$0xff]  }
 0x1ac   :  { %v1544_v49 = vadd.f32 %v1536_v6, %v1426_v48  ;;  %v1537_v12 = vmul.f32 %v1535_v3, %v1504_v9  ;;  %3876 = vmatprep.mubr.msk.bf16.mxu0 %vm2720_vm2, %v3997_v0 }
 0x1ad   :  { %v1547_v19 = vadd.f32 %v1539_v11, %v1429_v41 }
 0x1ae   :  { %v1545_v17 = vadd.f32 %v1537_v12, %v1427_v30 }
 0x1b0   :  { %v3670_v18 = vpop.f32.mrb[48].mxu1  ;;  %v3650_v20 = vpop.f32.mrb[44].mxu0 }
 0x1b1   :  { %v1656_v22 = vmul.f32 %v3670_v18, %v1653_v15  ;;  %v1619_v23 = vpop.f32.mrb[49].mxu1  ;;  %v1542_v25 = vmul.f32 %v3650_v20, %v1535_v3  ;;  %v1517_v21 = vpop.f32.mrb[45].mxu0 }
 0x1b2   :  { %v1654_v14 = vmul.f32 %v1653_v15, %v1619_v23  ;;  %v3671_v27 = vpop.f32.mrb[50].mxu1  ;;  %v1540_v29 = vmul.f32 %v1535_v3, %v1517_v21  ;;  %v3651_v31 = vpop.f32.mrb[46].mxu0 }
 0x1b3   :  { %v1664_v35 = vadd.f32 %v1656_v22, %v1546_v42  ;;  %v1550_v36 = vadd.f32 %v1542_v25, %v1432_v58  ;;  %v1657_v38 = vmul.f32 %v3671_v27, %v1653_v15  ;;  %v1622_v39 = vpop.f32.mrb[51].mxu1  ;;  %v1543_v40 = vmul.f32 %v3651_v31, %v1535_v3  ;;  %v1520_v44 = vpop.f32.mrb[47].mxu0 }
 0x1b4   :  { %v1662_v45 = vadd.f32 %v1654_v14, %v1544_v49  ;;  %v1548_v28 = vadd.f32 %v1540_v29, %v1430_v61  ;;  %v1655_v33 = vmul.f32 %v1653_v15, %v1622_v39  ;;  %v1541_v47 = vmul.f32 %v1535_v3, %v1520_v44 }
 0x1b5   :  { %v1665_v48 = vadd.f32 %v1657_v38, %v1547_v19  ;;  %v1551_v50 = vadd.f32 %v1543_v40, %v1433_v63  ;;  %v1771_v61 = vrot.slane %v4787_v7, %v826_v10  ;;  %v1889_v10 = vrot.slane %v4787_v7, %v944_v13 }
 0x1b6   :  { %v1663_v37 = vadd.f32 %v1655_v33, %v1545_v17  ;;  %v1549_v51 = vadd.f32 %v1541_v47, %v1431_v2 }
 0x1b8   :  { %v3674_v41 = vpop.f32.mrb[52].mxu1 }
 0x1b9   :  { %v1660_v52 = vmul.f32 %v3674_v41, %v1653_v15  ;;  %v1635_v30 = vpop.f32.mrb[53].mxu1 }
 0x1ba   :  { %v1658_v53 = vmul.f32 %v1653_v15, %v1635_v30  ;;  %v3675_v54 = vpop.f32.mrb[54].mxu1 }
 0x1bb   :  { %v1668_v32 = vadd.f32 %v1660_v52, %v1550_v36  ;;  %v1661_v43 = vmul.f32 %v3675_v54, %v1653_v15  ;;  %v1638_v56 = vpop.f32.mrb[55].mxu1 }
 0x1bc   :  { %v1666_v57 = vadd.f32 %v1658_v53, %v1548_v28  ;;  %v1659_v58 = vmul.f32 %v1653_v15, %v1638_v56  ;;  %v2007_v56 = vrot.slane %v4787_v7, %v1062_v8 }
 0x1bd   :  { %v1669_v59 = vadd.f32 %v1661_v43, %v1551_v50 }
 0x1be   :  { %v1667_v60 = vadd.f32 %v1659_v58, %v1549_v51 }
 0x1c8   :  { %v3694_v1 = vpop.f32.mrb[48].mxu0 }
 0x1c9   :  { %v1774_v63 = vmul.f32 %v3694_v1, %v1771_v61  ;;  %v1737_v3 = vpop.f32.mrb[49].mxu0 }
 0x1ca   :  { %v1772_v2 = vmul.f32 %v1771_v61, %v1737_v3  ;;  %v3695_v5 = vpop.f32.mrb[50].mxu0 }
 0x1cb   :  { %v1782_v4 = vadd.f32 %v1774_v63, %v1664_v35  ;;  %v1775_v62 = vmul.f32 %v3695_v5, %v1771_v61  ;;  %v1740_v6 = vpop.f32.mrb[51].mxu0 }
 0x1cc   :  { %v1780_v42 = vadd.f32 %v1772_v2, %v1662_v45  ;;  %v1773_v11 = vmul.f32 %v1771_v61, %v1740_v6 }
 0x1cd   :  { %v1783_v9 = vadd.f32 %v1775_v62, %v1665_v48  ;;  %v2125_v62 = vrot.slane %v4787_v7, %v1180_v16 }
 0x1ce   :  { %v1781_v49 = vadd.f32 %v1773_v11, %v1663_v37 }
 0x1d0   :  { %v3718_v12 = vpop.f32.mrb[56].mxu1  ;;  %v3698_v15 = vpop.f32.mrb[52].mxu0 }
 0x1d1   :  { %v1892_v19 = vmul.f32 %v3718_v12, %v1889_v10  ;;  %v1855_v17 = vpop.f32.mrb[57].mxu1  ;;  %v1778_v18 = vmul.f32 %v3698_v15, %v1771_v61  ;;  %v1753_v20 = vpop.f32.mrb[53].mxu0 }
 0x1d2   :  { %v1890_v22 = vmul.f32 %v1889_v10, %v1855_v17  ;;  %v3719_v23 = vpop.f32.mrb[58].mxu1  ;;  %v1776_v25 = vmul.f32 %v1771_v61, %v1753_v20  ;;  %v3699_v21 = vpop.f32.mrb[54].mxu0 }
 0x1d3   :  { %v1900_v14 = vadd.f32 %v1892_v19, %v1782_v4  ;;  %v1786_v27 = vadd.f32 %v1778_v18, %v1668_v32  ;;  %v1893_v29 = vmul.f32 %v3719_v23, %v1889_v10  ;;  %v1858_v31 = vpop.f32.mrb[59].mxu1  ;;  %v1779_v35 = vmul.f32 %v3699_v21, %v1771_v61  ;;  %v1756_v36 = vpop.f32.mrb[55].mxu0 }
 0x1d4   :  { %v1898_v13 = vadd.f32 %v1890_v22, %v1780_v42  ;;  %v1784_v38 = vadd.f32 %v1776_v25, %v1666_v57  ;;  %v1891_v39 = vmul.f32 %v1889_v10, %v1858_v31  ;;  %v1777_v40 = vmul.f32 %v1771_v61, %v1756_v36 }
 0x1d5   :  { %v1901_v44 = vadd.f32 %v1893_v29, %v1783_v9  ;;  %v1787_v45 = vadd.f32 %v1779_v35, %v1669_v59 }
 0x1d6   :  { %v1899_v28 = vadd.f32 %v1891_v39, %v1781_v49  ;;  %v1785_v33 = vadd.f32 %v1777_v40, %v1667_v60 }
 0x1d8   :  { %v3722_v47 = vpop.f32.mrb[60].mxu1 }
 0x1d9   :  { %v1896_v48 = vmul.f32 %v3722_v47, %v1889_v10  ;;  %v1871_v50 = vpop.f32.mrb[61].mxu1 }
 0x1da   :  { %v1894_v37 = vmul.f32 %v1889_v10, %v1871_v50  ;;  %v3723_v51 = vpop.f32.mrb[62].mxu1  ;;  %v4816_v50 = vld [vmem:[%s4859_s1 + $0x10] sm:$0xf] }
 0x1db   :  { %v1904_v41 = vadd.f32 %v1896_v48, %v1786_v27  ;;  %v1897_v52 = vmul.f32 %v3723_v51, %v1889_v10  ;;  %v1874_v30 = vpop.f32.mrb[63].mxu1 }
 0x1dc   :  { %v1902_v53 = vadd.f32 %v1894_v37, %v1784_v38  ;;  %v1895_v54 = vmul.f32 %v1889_v10, %v1874_v30  ;;  %v2243_v37 = vrot.slane %v4816_v50, %v4493_v26 }
 0x1dd   :  { %v1905_v32 = vadd.f32 %v1897_v52, %v1787_v45 }
 0x1de   :  { %v1903_v43 = vadd.f32 %v1895_v54, %v1785_v33 }
 0x1e8   :  { %v3742_v57 = vpop.f32.mrb[56].mxu0 }
 0x1e9   :  { %v2010_v58 = vmul.f32 %v3742_v57, %v2007_v56  ;;  %v1973_v59 = vpop.f32.mrb[57].mxu0 }
 0x1ea   :  { %v2008_v60 = vmul.f32 %v2007_v56, %v1973_v59  ;;  %v3743_v61 = vpop.f32.mrb[58].mxu0 }
 0x1eb   :  { %v2018_v1 = vadd.f32 %v2010_v58, %v1900_v14  ;;  %v2011_v63 = vmul.f32 %v3743_v61, %v2007_v56  ;;  %v1976_v3 = vpop.f32.mrb[59].mxu0  ;;  %v2361_v58 = vrot.slane %v4816_v50, %v4521_v34 }
 0x1ec   :  { %v2016_v2 = vadd.f32 %v2008_v60, %v1898_v13  ;;  %v2009_v5 = vmul.f32 %v2007_v56, %v1976_v3 }
 0x1ed   :  { %v2019_v4 = vadd.f32 %v2011_v63, %v1901_v44 }
 0x1ee   :  { %v2017_v6 = vadd.f32 %v2009_v5, %v1899_v28 }
 0x1f0   :  { %v3766_v0 = vpop.f32.mrb[64].mxu1  ;;  %v3746_v42 = vpop.f32.mrb[60].mxu0 }
 0x1f1   :  { %v2128_v11 = vmul.f32 %v3766_v0, %v2125_v62  ;;  %v2091_v8 = vpop.f32.mrb[65].mxu1  ;;  %v2014_v9 = vmul.f32 %v3746_v42, %v2007_v56  ;;  %v1989_v10 = vpop.f32.mrb[61].mxu0 }
 0x1f2   :  { %v2126_v49 = vmul.f32 %v2125_v62, %v2091_v8  ;;  %v3767_v12 = vpop.f32.mrb[66].mxu1  ;;  %v2012_v15 = vmul.f32 %v2007_v56, %v1989_v10  ;;  %v3747_v19 = vpop.f32.mrb[62].mxu0 }
 0x1f3   :  { %v2136_v17 = vadd.f32 %v2128_v11, %v2018_v1  ;;  %v2022_v18 = vadd.f32 %v2014_v9, %v1904_v41  ;;  %v2129_v20 = vmul.f32 %v3767_v12, %v2125_v62  ;;  %v2094_v22 = vpop.f32.mrb[67].mxu1  ;;  %v2015_v23 = vmul.f32 %v3747_v19, %v2007_v56  ;;  %v1992_v25 = vpop.f32.mrb[63].mxu0 }
 0x1f4   :  { %v2134_v24 = vadd.f32 %v2126_v49, %v2016_v2  ;;  %v2020_v21 = vadd.f32 %v2012_v15, %v1902_v53  ;;  %v2127_v16 = vmul.f32 %v2125_v62, %v2094_v22  ;;  %v2013_v7 = vmul.f32 %v2007_v56, %v1992_v25 }
 0x1f5   :  { %v2137_v14 = vadd.f32 %v2129_v20, %v2019_v4  ;;  %v2023_v27 = vadd.f32 %v2015_v23, %v1905_v32 }
 0x1f6   :  { %v2135_v29 = vadd.f32 %v2127_v16, %v2017_v6  ;;  %v2021_v31 = vadd.f32 %v2013_v7, %v1903_v43 }
 0x1f8   :  { %v3770_v35 = vpop.f32.mrb[68].mxu1 }
 0x1f9   :  { %v2132_v36 = vmul.f32 %v3770_v35, %v2125_v62  ;;  %v2107_v13 = vpop.f32.mrb[69].mxu1 }
 0x1fa   :  { %v2130_v38 = vmul.f32 %v2125_v62, %v2107_v13  ;;  %v3771_v39 = vpop.f32.mrb[70].mxu1  ;;  %v2625_v13 = vpop.permute.xlu0 %2624 }
 0x1fb   :  { %v2140_v40 = vadd.f32 %v2132_v36, %v2022_v18  ;;  %v2133_v44 = vmul.f32 %v3771_v39, %v2125_v62  ;;  %v2110_v45 = vpop.f32.mrb[71].mxu1  ;;  %v2479_v36 = vrot.slane %v4816_v50, %v4614_v46  ;;  %v2635_v39 = vpop.permute.xlu1 %2634 }
 0x1fc   :  { %v2138_v28 = vadd.f32 %v2130_v38, %v2020_v21  ;;  %v2131_v33 = vmul.f32 %v2125_v62, %v2110_v45 }
 0x1fd   :  { %v2141_v47 = vadd.f32 %v2133_v44, %v2023_v27 }
 0x1fe   :  { %v2139_v48 = vadd.f32 %v2131_v33, %v2021_v31 }
 0x208   :  { %v3790_v51 = vpop.f32.mrb[64].mxu0 }
 0x209   :  { %v2246_v41 = vmul.f32 %v3790_v51, %v2243_v37  ;;  %v2209_v52 = vpop.f32.mrb[65].mxu0 }
 0x20a   :  { %v2244_v30 = vmul.f32 %v2243_v37, %v2209_v52  ;;  %v3791_v53 = vpop.f32.mrb[66].mxu0 }
 0x20b   :  { %v2254_v54 = vadd.f32 %v2246_v41, %v2136_v17  ;;  %v2247_v32 = vmul.f32 %v3791_v53, %v2243_v37  ;;  %v2212_v43 = vpop.f32.mrb[67].mxu0  ;;  %v2597_v41 = vrot.slane %v4816_v50, %v4638_v55  ;;  %v2630_v53 = vpop.permute.xlu0 %2629 }
 0x20c   :  { %v2252_v56 = vadd.f32 %v2244_v30, %v2134_v24  ;;  %v2245_v57 = vmul.f32 %v2243_v37, %v2212_v43 }
 0x20d   :  { %v2255_v59 = vadd.f32 %v2247_v32, %v2137_v14 }
 0x20e   :  { %v2253_v60 = vadd.f32 %v2245_v57, %v2135_v29 }
 0x210   :  { %v3814_v61 = vpop.f32.mrb[72].mxu1  ;;  %v3794_v1 = vpop.f32.mrb[68].mxu0 }
 0x211   :  { %v2364_v63 = vmul.f32 %v3814_v61, %v2361_v58  ;;  %v2327_v3 = vpop.f32.mrb[73].mxu1  ;;  %v2250_v26 = vmul.f32 %v3794_v1, %v2243_v37  ;;  %v2225_v2 = vpop.f32.mrb[69].mxu0 }
 0x212   :  { %v2362_v5 = vmul.f32 %v2361_v58, %v2327_v3  ;;  %v3815_v4 = vpop.f32.mrb[74].mxu1  ;;  %v2248_v62 = vmul.f32 %v2243_v37, %v2225_v2  ;;  %v3795_v6 = vpop.f32.mrb[70].mxu0 }
 0x213   :  { %v2372_v0 = vadd.f32 %v2364_v63, %v2254_v54  ;;  %v2258_v42 = vadd.f32 %v2250_v26, %v2140_v40  ;;  %v2365_v11 = vmul.f32 %v3815_v4, %v2361_v58  ;;  %v2330_v8 = vpop.f32.mrb[75].mxu1  ;;  %v2251_v9 = vmul.f32 %v3795_v6, %v2243_v37  ;;  %v2228_v10 = vpop.f32.mrb[71].mxu0 }
 0x214   :  { %v2370_v49 = vadd.f32 %v2362_v5, %v2252_v56  ;;  %v2256_v34 = vadd.f32 %v2248_v62, %v2138_v28  ;;  %v2363_v12 = vmul.f32 %v2361_v58, %v2330_v8  ;;  %v2249_v15 = vmul.f32 %v2243_v37, %v2228_v10  ;;  %v2640_v54 = vpop.permute.xlu1 %2639  ;;  %v2645_v8 = vpop.permute.xlu0 %2644 }
 0x215   :  { %v2373_v19 = vadd.f32 %v2365_v11, %v2255_v59  ;;  %v2259_v17 = vadd.f32 %v2251_v9, %v2141_v47 }
 0x216   :  { %v2371_v18 = vadd.f32 %v2363_v12, %v2253_v60  ;;  %v2257_v20 = vadd.f32 %v2249_v15, %v2139_v48 }
 0x218   :  { %v3818_v22 = vpop.f32.mrb[76].mxu1  ;;  %v2650_v12 = vpop.permute.xlu1 %2649 }
 0x219   :  { %v2368_v23 = vmul.f32 %v3818_v22, %v2361_v58  ;;  %v2343_v25 = vpop.f32.mrb[77].mxu1 }
 0x21a   :  { %v2366_v24 = vmul.f32 %v2361_v58, %v2343_v25  ;;  %v3819_v21 = vpop.f32.mrb[78].mxu1 }
 0x21b   :  { %v2376_v16 = vadd.f32 %v2368_v23, %v2258_v42  ;;  %v2369_v7 = vmul.f32 %v3819_v21, %v2361_v58  ;;  %v2346_v14 = vpop.f32.mrb[79].mxu1 }
 0x21c   :  { %v2374_v27 = vadd.f32 %v2366_v24, %v2256_v34  ;;  %v2367_v29 = vmul.f32 %v2361_v58, %v2346_v14 }
 0x21d   :  { %v2377_v31 = vadd.f32 %v2369_v7, %v2259_v17 }
 0x21e   :  { %v2375_v35 = vadd.f32 %v2367_v29, %v2257_v20  ;;  %v2655_v29 = vpop.permute.xlu0 %2654 }
 0x228   :  { %v3838_v38 = vpop.f32.mrb[72].mxu0 }
 0x229   :  { %v2482_v40 = vmul.f32 %v3838_v38, %v2479_v36  ;;  %v2445_v44 = vpop.f32.mrb[73].mxu0 }
 0x22a   :  { %v2480_v45 = vmul.f32 %v2479_v36, %v2445_v44  ;;  %v3839_v28 = vpop.f32.mrb[74].mxu0 }
 0x22b   :  { %v2490_v33 = vadd.f32 %v2482_v40, %v2372_v0  ;;  %v2483_v47 = vmul.f32 %v3839_v28, %v2479_v36  ;;  %v2448_v48 = vpop.f32.mrb[75].mxu0 }
 0x22c   :  { %v2488_v37 = vadd.f32 %v2480_v45, %v2370_v49  ;;  %v2481_v51 = vmul.f32 %v2479_v36, %v2448_v48 }
 0x22d   :  { %v2491_v52 = vadd.f32 %v2483_v47, %v2373_v19 }
 0x22e   :  { %v2489_v30 = vadd.f32 %v2481_v51, %v2371_v18 }
 0x230   :  { %v3862_v46 = vpop.f32.mrb[80].mxu1  ;;  %v3842_v32 = vpop.f32.mrb[76].mxu0 }
 0x231   :  { %v2600_v43 = vmul.f32 %v3862_v46, %v2597_v41  ;;  %v2563_v56 = vpop.f32.mrb[81].mxu1  ;;  %v2486_v57 = vmul.f32 %v3842_v32, %v2479_v36  ;;  %v2461_v58 = vpop.f32.mrb[77].mxu0 }
 0x232   :  { %v2598_v59 = vmul.f32 %v2597_v41, %v2563_v56  ;;  %v3863_v60 = vpop.f32.mrb[82].mxu1  ;;  %v2484_v61 = vmul.f32 %v2479_v36, %v2461_v58  ;;  %v3843_v1 = vpop.f32.mrb[78].mxu0 }
 0x233   :  { %v2608_v63 = vadd.f32 %v2600_v43, %v2490_v33  ;;  %v2494_v3 = vadd.f32 %v2486_v57, %v2376_v16  ;;  %v2601_v26 = vmul.f32 %v3863_v60, %v2597_v41  ;;  %v2566_v2 = vpop.f32.mrb[83].mxu1  ;;  %v2487_v5 = vmul.f32 %v3843_v1, %v2479_v36  ;;  %v2464_v55 = vpop.f32.mrb[79].mxu0 }
 0x234   :  { %v2606_v50 = vadd.f32 %v2598_v59, %v2488_v37  ;;  %v2492_v4 = vadd.f32 %v2484_v61, %v2374_v27  ;;  %v2599_v62 = vmul.f32 %v2597_v41, %v2566_v2  ;;  %v2485_v6 = vmul.f32 %v2479_v36, %v2464_v55 }
 0x235   :  { %v2664_v0 = vadd.f32 %v2635_v39, %v2608_v63  ;;  %v2609_v42 = vadd.f32 %v2601_v26, %v2491_v52  ;;  %v2495_v11 = vadd.f32 %v2487_v5, %v2377_v31  ;;  %v2660_v39 = vpop.permute.xlu1 %2659 }
 0x236   :  { %v2662_v9 = vadd.f32 %v2625_v13, %v2606_v50  ;;  %v2607_v10 = vadd.f32 %v2599_v62, %v2489_v30  ;;  %v2493_v49 = vadd.f32 %v2485_v6, %v2375_v35  ;;  %v3999_v30 = vld [vmem:[%s4865_s7] sm:$0xff]   ;;  %v4000_v50 = vld [vmem:[%s4865_s7 + $0x8] sm:$0xff]  }
 0x237   :  { %v2665_v34 = vadd.f32 %v2640_v54, %v2609_v42  ;;  %v2672_v17 = vmax.f32 %v2664_v0, 0.0  ;;  %3884 = vmatprep.mubr.msk.bf16.mxu1 %vm2820_vm3, %v3999_v30 }
 0x238   :  { %v2663_v15 = vadd.f32 %v2630_v53, %v2607_v10  ;;  %v3866_v19 = vpop.f32.mrb[84].mxu1  ;;  %v2670_v23 = vmax.f32 %v2662_v9, 0.0  ;;  %v2693_v53 = vpop.permute.xlu0 %2692 }
 0x239   :  { %v2673_v18 = vmax.f32 %v2665_v34, 0.0  ;;  %v2604_v20 = vmul.f32 %v3866_v19, %v2597_v41  ;;  %v2579_v22 = vpop.f32.mrb[85].mxu1  ;;  %v2698_v54 = vpop.permute.xlu1 %2697 }
 0x23a   :  { %v2671_v25 = vmax.f32 %v2663_v15, 0.0  ;;  %v2602_v24 = vmul.f32 %v2597_v41, %v2579_v22  ;;  %v3867_v21 = vpop.f32.mrb[86].mxu1 }
 0x23b   :  { %v2612_v16 = vadd.f32 %v2604_v20, %v2494_v3  ;;  %v2605_v7 = vmul.f32 %v3867_v21, %v2597_v41  ;;  %v2582_v14 = vpop.f32.mrb[87].mxu1  ;;  %v2679_v27 = vpack.c.bf16 %v2673_v18, %v2672_v17 }
 0x23c   :  { %v2610_v31 = vadd.f32 %v2602_v24, %v2492_v4  ;;  %v2603_v36 = vmul.f32 %v2597_v41, %v2582_v14  ;;  %v2678_v35 = vpack.c.bf16 %v2671_v25, %v2670_v23  ;;  %v3998_v41 = vld [vmem:[%s4863_s5 + $0x8] sm:$0xff]   ;;  %v2703_v46 = vpop.permute.xlu0 %2702  ;;  %v4001_v4 = vld [vmem:[%s4867_s9] sm:$0xff]  }
 0x23d   :  { %v2668_v13 = vadd.f32 %v2655_v29, %v2612_v16  ;;  %v2613_v38 = vadd.f32 %v2605_v7, %v2495_v11  ;;  %v2708_v57 = vpop.permute.xlu1 %2707  ;;  %v4002_v25 = vld [vmem:[%s4867_s9 + $0x8] sm:$0xff]   ;;  %s4036_s9 = scalar_lea.vmem %s2985_s28, 512 }
 0x23e   :  { %v2666_v40 = vadd.f32 %v2645_v8, %v2610_v31  ;;  %v2611_v44 = vadd.f32 %v2603_v36, %v2493_v49  ;;  %3868 = vmatprep.subr.bf16.mxu0 %v2678_v35  ;;  %p4037_p8 = scmp.ne.s32.totalorder %s2985_s28, %s4036_s9  ;;  %p4042_p10 = scmp.lt.s32.totalorder %s4036_s9, %s4036_s9 }
 0x23f   :  { %v2669_v45 = vadd.f32 %v2660_v39, %v2613_v38  ;;  %3869 = vmatpush3.bf16.msra.mxu0 %v2678_v35  ;;  %v2676_v33 = vmax.f32 %v2668_v13, 0.0 }
 0x240   :  { %v2667_v28 = vadd.f32 %v2650_v12, %v2611_v44  ;;  %3870 = vmatprep.subr.bf16.mxu0 %v2679_v27  ;;  %v2674_v48 = vmax.f32 %v2666_v40, 0.0  ;;  %v2793_v62 = vpop.permute.xlu0 %2792  ;;  %p4043_p11 = por %p4042_p10, %p4041_p9 }
 0x241   :  { %v2677_v47 = vmax.f32 %v2669_v45, 0.0  ;;  %v2798_v6 = vpop.permute.xlu1 %2797 }
 0x242   :  { %v2675_v37 = vmax.f32 %v2667_v28, 0.0  ;;  %p4044_p12 = pnand %p4043_p11, %p4037_p8 }
 0x243   :  { %3871 = vmatpush3.bf16.msra.mxu0 %v2679_v27  ;;  %v2681_v51 = vpack.c.bf16 %v2677_v47, %v2676_v33 }
 0x244   :  { %v2680_v52 = vpack.c.bf16 %v2675_v37, %v2674_v48  ;;  %v2803_v0 = vpop.permute.xlu0 %2802 }
 0x245   :  { %v2808_v9 = vpop.permute.xlu1 %2807 }
 0x246   :  { %3872 = vmatprep.subr.bf16.mxu0 %v2680_v52 }
 0x247   :  { %3873 = vmatpush3.bf16.msra.mxu0 %v2680_v52 }
 0x248   :  { %3874 = vmatprep.subr.bf16.mxu0 %v2681_v51  ;;  %v2893_v24 = vpop.permute.xlu0 %2892 }
 0x249   :  { %v2898_v21 = vpop.permute.xlu1 %2897 }
 0x24b   :  { %3875 = vmatpush3.bf16.msra.mxu0 %v2681_v51 }
 0x24c   :  { %v2903_v16 = vpop.permute.xlu0 %2902 }
 0x24d   :  { %v2908_v29 = vpop.permute.xlu1 %2907 }
 0x24e   :  { %3877 = vmatmul.mubr.msk.bf16.vlgmr.msra.gmra.mrb[80].mxu0 %vm2720_vm2, %v3998_v41 }
 0x24f   :  { %3892 = vmatprep.mubr.msk.bf16.mxu0 %vm2820_vm3, %v4001_v4 }
 0x321   :  { %v3878_v32 = vpop.f32.mrb[80].mxu0 }
 0x322   :  { %v2770_v43 = vadd.f32 %v3878_v32, %v2703_v46  ;;  %v2761_v56 = vpop.f32.mrb[81].mxu0 }
 0x323   :  { %v2762_v58 = vadd.f32 %v2761_v56, %v2693_v53  ;;  %v3879_v59 = vpop.f32.mrb[82].mxu0 }
 0x324   :  { %v2773_v60 = vadd.f32 %v3879_v59, %v2708_v57  ;;  %v2764_v61 = vpop.f32.mrb[83].mxu0  ;;  %v2778_v63 = vmax.f32 %v2770_v43, 0.0 }
 0x325   :  { %v2765_v1 = vadd.f32 %v2764_v61, %v2698_v54  ;;  %v2776_v26 = vmax.f32 %v2762_v58, 0.0 }
 0x326   :  { %v2779_v3 = vmax.f32 %v2773_v60, 0.0 }
 0x327   :  { %v2777_v2 = vmax.f32 %v2765_v1, 0.0 }
 0x328   :  { %v2781_v5 = vpack.c.bf16 %v2779_v3, %v2778_v63 }
 0x329   :  { %v2780_v55 = vpack.c.bf16 %v2777_v2, %v2776_v26 }
 0x32b   :  { %3880 = vmatprep.subr.bf16.mxu1 %v2780_v55 }
 0x32c   :  { %3881 = vmatpush3.bf16.msra.mxu1 %v2780_v55 }
 0x32d   :  { %3882 = vmatprep.subr.bf16.mxu1 %v2781_v5 }
 0x330   :  { %3883 = vmatpush3.bf16.msra.mxu1 %v2781_v5 }
 0x333   :  { %3885 = vmatmul.mubr.msk.bf16.vlgmr.msra.gmra.mrb[88].mxu1 %vm2820_vm3, %v4000_v50 }
 0x406   :  { %v3886_v42 = vpop.f32.mrb[88].mxu1 }
 0x407   :  { %v2870_v11 = vadd.f32 %v3886_v42, %v2803_v0  ;;  %v2861_v8 = vpop.f32.mrb[89].mxu1 }
 0x408   :  { %v2862_v10 = vadd.f32 %v2861_v8, %v2793_v62  ;;  %v3887_v49 = vpop.f32.mrb[90].mxu1 }
 0x409   :  { %v2873_v34 = vadd.f32 %v3887_v49, %v2808_v9  ;;  %v2864_v12 = vpop.f32.mrb[91].mxu1  ;;  %v2878_v19 = vmax.f32 %v2870_v11, 0.0 }
 0x40a   :  { %v2865_v15 = vadd.f32 %v2864_v12, %v2798_v6  ;;  %v2876_v18 = vmax.f32 %v2862_v10, 0.0 }
 0x40b   :  { %v2879_v17 = vmax.f32 %v2873_v34, 0.0 }
 0x40c   :  { %v2877_v20 = vmax.f32 %v2865_v15, 0.0 }
 0x40d   :  { %v2881_v22 = vpack.c.bf16 %v2879_v17, %v2878_v19 }
 0x40e   :  { %v2880_v23 = vpack.c.bf16 %v2877_v20, %v2876_v18 }
 0x410   :  { %3888 = vmatprep.subr.bf16.mxu0 %v2880_v23 }
 0x411   :  { %3889 = vmatpush3.bf16.msra.mxu0 %v2880_v23 }
 0x412   :  { %3890 = vmatprep.subr.bf16.mxu0 %v2881_v22 }
 0x415   :  { %3891 = vmatpush3.bf16.msra.mxu0 %v2881_v22 }
 0x418   :  { %3893 = vmatmul.mubr.msk.bf16.vlgmr.msra.gmra.mrb[84].mxu0 %vm2820_vm3, %v4002_v25 }
 0x4eb   :  { %v3894_v7 = vpop.f32.mrb[84].mxu0 }
 0x4ec   :  { %v2969_v14 = vadd.f32 %v3894_v7, %v2903_v16  ;;  %v2960_v27 = vpop.f32.mrb[85].mxu0 }
 0x4ed   :  { %v2961_v31 = vadd.f32 %v2960_v27, %v2893_v24  ;;  %v3895_v36 = vpop.f32.mrb[86].mxu0 }
 0x4ee   :  { %2977 = vst [vmem:[#allocation5 + $0x10] sm:$0xff] %v2969_v14  ;;  %v2972_v35 = vadd.f32 %v3895_v36, %v2908_v29  ;;  %v2963_v13 = vpop.f32.mrb[87].mxu0 }
 0x4ef   :  { %2975 = vst [vmem:[#allocation5] sm:$0xff] %v2961_v31  ;;  %v2964_v38 = vadd.f32 %v2963_v13, %v2898_v21 }
 0x4f0   :  { %2978 = vst [vmem:[#allocation5 + $0x18] sm:$0xff] %v2972_v35 }
 0x4f1   :  { %2976 = vst [vmem:[#allocation5 + $0x8] sm:$0xff] %v2964_v38 }
 0x4f2   :  { %4047 = shalt.err (!%p4044_p12)
}
 0x4f3   :  { %s4048_s12 = scalar_lea.hbm %s4869_s11, 512 }
 0x4f4   :  { %p4049_p13 = scmp.ne.s32.totalorder %s4869_s11, %s4048_s12  ;;  %p4052_p0 = scmp.lt.u32.totalorder %s4048_s12, %s4869_s11 }
 0x4f6   :  { %p4054_p1 = pnand %p4052_p0, %p4049_p13 }
 0x4f8   :  { %4057 = shalt.err (!%p4054_p1)
}
 0x4f9   :  { %s4067_s16 = smov 128   ;;  %s4068_s17 = smov 8  }
 0x4fa   :  { %2990 = dma.vmem_to_hbm [thread:$0]  %s2985_s28, 512, %s4869_s11, [#allocation4], %s4067_s16, %s4067_s16, %s4068_s17  }
 0x4fb   :  { %4060 = dma.done.wait [#allocation4], 512  }
 0x4fc   :  { %4061 = vsyncadd [#allocation4], 4294966784 }
 0x4fd   :  { %2994 = vsyncpa [#allocation3], 1 }
 0x4fe   :  { %2995 = vsyncpa [#allocation4], 1 }

</bundles_post_ra>
